<compile_context>
chip_gen: v7x
topology: tpu7x:2x2x1
jax: 0.10.0
libtpu: 0.0.40
codegen_flags: <defaults>
</compile_context>

<pallas_src>
import jax
import jax.numpy as jnp
from jax.experimental import pallas as pl
from jax.experimental.pallas import tpu as pltpu


def _round_up(x, m):
    return (x + m - 1) // m * m


def film_kernel(x_ref, w_ref, f_ref, p_ref, o_ref):
    # x_ref: (1, tN, Dp)   w_ref: (Dp, Hp)
    # f_ref, p_ref: (1, 1, Hp) fp32   o_ref: (1, tN, Hp)
    h = jnp.dot(x_ref[0], w_ref[...],
                preferred_element_type=jnp.float32)        # MXU, fp32 accum (tN, Hp)
    # FiLM + sine kept in fp32 (sin range reduction is precision sensitive);
    # cast only at the final store.
    o_ref[0] = jnp.sin(f_ref[0] * h + p_ref[0]).astype(o_ref.dtype)


def film_layer(x, w, b, freq, phase, *, tile_n=512):
    """sin(freq * (x @ W^T + b) + phase).

    x:     (B, N, D_in)   fp32 or bf16
    w:     (H, D_in)      PyTorch nn.Linear weight layout
    b:     (H,)
    freq:  (B, 1, H)
    phase: (B, 1, H)
    Returns (B, N, H) in x.dtype.
    """
    B, N, D_in = x.shape
    H = w.shape[0]
    out_dtype = x.dtype

    # Fold bias into the phase term: sin(f*(xW+b)+p) == sin(f*xW + (f*b + p)).
    freq32 = freq.astype(jnp.float32)
    phase_eff = freq32 * b.astype(jnp.float32).reshape(1, 1, H) + phase.astype(jnp.float32)

    # Lane-dense padding: K (D_in) and H to multiples of 128; N tiled by tN rows.
    Dp = _round_up(D_in, 128)
    Hp = _round_up(H, 128)
    tN = min(tile_n, _round_up(N, 8))
    Np = _round_up(N, tN)

    # Zero-padded operands (zeros in padded K rows / H cols keep results exact).
    w_t = jnp.zeros((Dp, Hp), dtype=x.dtype).at[:D_in, :H].set(w.T.astype(x.dtype))
    x_p = jnp.pad(x, ((0, 0), (0, Np - N), (0, Dp - D_in)))
    f_p = jnp.pad(freq32, ((0, 0), (0, 0), (0, Hp - H)))
    p_p = jnp.pad(phase_eff, ((0, 0), (0, 0), (0, Hp - H)))

    grid = (B, Np // tN)

    out = pl.pallas_call(
        film_kernel,
        out_shape=jax.ShapeDtypeStruct((B, Np, Hp), out_dtype),
        grid_spec=pltpu.PrefetchScalarGridSpec(
            num_scalar_prefetch=0,
            grid=grid,
            in_specs=[
                pl.BlockSpec((1, tN, Dp), lambda bi, ni: (bi, ni, 0)),   # x tile
                pl.BlockSpec((Dp, Hp),    lambda bi, ni: (0, 0)),        # weight, resident
                pl.BlockSpec((1, 1, Hp),  lambda bi, ni: (bi, 0, 0)),    # freq (per-batch)
                pl.BlockSpec((1, 1, Hp),  lambda bi, ni: (bi, 0, 0)),    # phase' (per-batch)
            ],
            out_specs=pl.BlockSpec((1, tN, Hp), lambda bi, ni: (bi, ni, 0)),
        ),
        compiler_params=pltpu.CompilerParams(
            dimension_semantics=("parallel", "parallel"),
        ),
    )(x_p, w_t, f_p, p_p)

    return out[:, :N, :H]


def film_layer_ref(x, w, b, freq, phase):
    h = jnp.einsum(
        "bnd,hd->bnh",
        x.astype(jnp.float32),
        w.astype(jnp.float32),
        preferred_element_type=jnp.float32,
    ) + b.astype(jnp.float32)
    return jnp.sin(freq.astype(jnp.float32) * h + phase.astype(jnp.float32))


if __name__ == "__main__":
    key = jax.random.PRNGKey(0)
    k_x, k_w, k_b, k_f, k_p = jax.random.split(key, 5)

    B, N, D_in, H = 2, 64, 32, 32

    # PyTorch nn.Linear shapes: W (H, D_in), b (H,)
    w = jax.random.uniform(k_w, (H, D_in), jnp.float32, -0.1, 0.1)
    b = jax.random.uniform(k_b, (H,), jnp.float32, -0.1, 0.1)

    x = jax.random.normal(k_x, (B, N, D_in), jnp.float32)
    freq = jax.random.normal(k_f, (B, 1, H), jnp.float32) * 15.0 + 30.0
    phase = jax.random.normal(k_p, (B, 1, H), jnp.float32)

    # fp32 path: correctness check against pure-JAX reference.
    out = jax.block_until_ready(film_layer(x, w, b, freq, phase))
    ref = film_layer_ref(x, w, b, freq, phase)
    assert out.shape == (B, N, H)
    # Tolerance accounts for MXU fp32 (multi-pass) matmul amplified by freq ~ O(45)
    # before the sine; output range is [-1, 1] so 2e-3 is still tight.
    assert jnp.allclose(out, ref, atol=2e-3, rtol=2e-3), (
        float(jnp.max(jnp.abs(out - ref)))
    )

    # bf16 I/O path (HBM-traffic halving): smoke test (math stays fp32 inside).
    out_bf16 = jax.block_until_ready(
        film_layer(x.astype(jnp.bfloat16), w.astype(jnp.bfloat16), b, freq, phase)
    )
    assert out_bf16.shape == (B, N, H)
    assert out_bf16.dtype == jnp.bfloat16
    assert bool(jnp.all(jnp.isfinite(out_bf16.astype(jnp.float32))))

    print("KERNEL_OK")
</pallas_src>

<mosaic_0001>
module attributes {stable_mosaic.version = 11 : i64} {
  func.func @film_kernel(%arg0: i32, %arg1: i32, %arg2: memref<1x64x128xf32, #tpu.memory_space<vmem>>, %arg3: memref<128x128xf32, #tpu.memory_space<vmem>>, %arg4: memref<1x1x128xf32, #tpu.memory_space<vmem>>, %arg5: memref<1x1x128xf32, #tpu.memory_space<vmem>>, %arg6: memref<1x64x128xf32, #tpu.memory_space<vmem>>) attributes {dimension_semantics = [#tpu.dimension_semantics<parallel>, #tpu.dimension_semantics<parallel>], iteration_bounds = array<i64: 2, 1>, scalar_prefetch = 0 : i64, scratch_operands = 0 : i64, tpu.core_type = #tpu.core_type<tc>, window_params = [{transform_indices = @transform_0, window_bounds = array<i64: 1, 64, 128>}, {pipeline_mode = #tpu.pipeline_mode<synchronous>, transform_indices = @transform_1, window_bounds = array<i64: 128, 128>}, {transform_indices = @transform_2, window_bounds = array<i64: 1, 1, 128>}, {transform_indices = @transform_3, window_bounds = array<i64: 1, 1, 128>}, {transform_indices = @transform_4, window_bounds = array<i64: 1, 64, 128>}]} {
    %c0 = arith.constant 0 : index
    %c0_0 = arith.constant 0 : index
    %c0_1 = arith.constant 0 : index
    %0 = vector.load %arg2[%c0, %c0_0, %c0_1] : memref<1x64x128xf32, #tpu.memory_space<vmem>>, vector<1x64x128xf32>
    %1 = vector.shape_cast %0 : vector<1x64x128xf32> to vector<64x128xf32>
    %c0_2 = arith.constant 0 : index
    %c0_3 = arith.constant 0 : index
    %2 = vector.load %arg3[%c0_2, %c0_3] : memref<128x128xf32, #tpu.memory_space<vmem>>, vector<128x128xf32>
    %cst = arith.constant dense<0.000000e+00> : vector<64x128xf32>
    %3 = tpu.matmul %1, %2, %cst {dimension_numbers = #tpu.dot_dimension_numbers<[1], [0], [0], [1], [0, 0, 1, 1], [], []>} : vector<64x128xf32>, vector<128x128xf32>, vector<64x128xf32> -> vector<64x128xf32>
    %c0_4 = arith.constant 0 : index
    %c0_5 = arith.constant 0 : index
    %c0_6 = arith.constant 0 : index
    %4 = vector.load %arg4[%c0_4, %c0_5, %c0_6] : memref<1x1x128xf32, #tpu.memory_space<vmem>>, vector<1x1x128xf32>
    %5 = vector.shape_cast %4 : vector<1x1x128xf32> to vector<1x128xf32>
    %6 = vector.broadcast %5 : vector<1x128xf32> to vector<64x128xf32>
    %7 = arith.mulf %6, %3 : vector<64x128xf32>
    %c0_7 = arith.constant 0 : index
    %c0_8 = arith.constant 0 : index
    %c0_9 = arith.constant 0 : index
    %8 = vector.load %arg5[%c0_7, %c0_8, %c0_9] : memref<1x1x128xf32, #tpu.memory_space<vmem>>, vector<1x1x128xf32>
    %9 = vector.shape_cast %8 : vector<1x1x128xf32> to vector<1x128xf32>
    %10 = vector.broadcast %9 : vector<1x128xf32> to vector<64x128xf32>
    %11 = arith.addf %7, %10 : vector<64x128xf32>
    %12 = math.sin %11 : vector<64x128xf32>
    %c0_10 = arith.constant 0 : index
    %c0_11 = arith.constant 0 : index
    %c0_12 = arith.constant 0 : index
    %13 = vector.load %arg6[%c0_10, %c0_11, %c0_12] : memref<1x64x128xf32, #tpu.memory_space<vmem>>, vector<1x64x128xf32>
    %14 = vector.shape_cast %13 : vector<1x64x128xf32> to vector<64x128xf32>
    %15 = vector.shape_cast %12 : vector<64x128xf32> to vector<1x64x128xf32>
    tpu.vector_store %arg6[%c0_10, %c0_11, %c0_12], %15 {strides = array<i32>} : memref<1x64x128xf32, #tpu.memory_space<vmem>>, vector<1x64x128xf32>,
    return
  }
  func.func @transform_0(%arg0: i32, %arg1: i32) -> (i32, i32, i32) {
    %c0_i32 = arith.constant 0 : i32
    %c0_i32_0 = arith.constant 0 : i32
    return %arg0, %arg1, %c0_i32 : i32, i32, i32
  }
  func.func @transform_1(%arg0: i32, %arg1: i32) -> (i32, i32) {
    %c0_i32 = arith.constant 0 : i32
    %c0_i32_0 = arith.constant 0 : i32
    %c0_i32_1 = arith.constant 0 : i32
    return %c0_i32, %c0_i32_0 : i32, i32
  }
  func.func @transform_2(%arg0: i32, %arg1: i32) -> (i32, i32, i32) {
    %c0_i32 = arith.constant 0 : i32
    %c0_i32_0 = arith.constant 0 : i32
    %c0_i32_1 = arith.constant 0 : i32
    return %arg0, %c0_i32, %c0_i32_0 : i32, i32, i32
  }
  func.func @transform_3(%arg0: i32, %arg1: i32) -> (i32, i32, i32) {
    %c0_i32 = arith.constant 0 : i32
    %c0_i32_0 = arith.constant 0 : i32
    %c0_i32_1 = arith.constant 0 : i32
    return %arg0, %c0_i32, %c0_i32_0 : i32, i32, i32
  }
  func.func @transform_4(%arg0: i32, %arg1: i32) -> (i32, i32, i32) {
    %c0_i32 = arith.constant 0 : i32
    %c0_i32_0 = arith.constant 0 : i32
    return %arg0, %arg1, %c0_i32 : i32, i32, i32
  }
}

</mosaic_0001>

<bundles_post_ra>
// kernel: tpu_custom_call.1
= control target key start
LH: loop header
LB: loop body
LE: loop exit
PB: predicated region body
PF: predicated region fallthrough
CT: control target
= control target key end

     0   :  { %9 = vsyncpa [#allocation3], 0  ;;  %s2857_s0 = inlined_call_operand.hbm [shape: f32[2,64,128], index: 0, kind: input, shape index: {}]   ;;  %s2858_s1 = inlined_call_operand.hbm [shape: f32[128,128], index: 1, kind: input, shape index: {}]   ;;  %s2859_s2 = inlined_call_operand.vmem [shape: f32[2,1,128], index: 2, kind: input, shape index: {}]   ;;  %s2860_s3 = inlined_call_operand.vmem [shape: f32[2,1,128], index: 3, kind: input, shape index: {}]   ;;  %s2861_s4 = inlined_call_operand.hbm [shape: f32[2,64,128], index: 4, kind: output, shape index: {}]  }
   0x1   :  { %11 = vsyncpa [#allocation3 + $0x1], 0 }
   0x2   :  { %12 = vsyncpa [#allocation6], 0 }
   0x3   :  { %13 = vsyncpa [#allocation4], 0 }
   0x4   :  { %15 = vsyncpa [#allocation4 + $0x1], 0  ;;  %s1911_s15 = smov 0   ;;  %s1913_s16 = smov 0  }
   0x5   :  { %s1915_s17 = smov 0   ;;  %s1917_s18 = smov 0  }
   0x6   :  { %s1919_s19 = smov 0   ;;  %s1921_s20 = smov 0  }
   0x7 LB: > { %s1409_s21 = sadd.s32 4294967295, %s1871_s20   ;;  %s1410_s22 = sadd.s32 4294967294, %s1871_s20   ;;  %s1871_s20 = sphi %s1921_s20, %s21_s20   ;;  %s1867_s19 = sphi %s1919_s19, %s2897_s19   ;;  %s1863_s18 = sphi %s1917_s18, %s2896_s18   ;;  %s1859_s17 = sphi %s1915_s17, %s2895_s17   ;;  %s1855_s16 = sphi %s1913_s16, %s2894_s16   ;;  %s1851_s15 = sphi %s1911_s15, %s2893_s15  }
   0x8   : > { %p55_p0 = scmp.ne.s32.totalorder %s1855_s16, %s1851_s15  ;;  %p1945_p1 = scmp.eq.s32.totalorder %s1409_s21, 0 }
   0x9   : > { %p1949_p2 = scmp.eq.s32.totalorder %s1409_s21, 1  ;;  %p160_p3 = scmp.eq.s32.totalorder %s1410_s22, 1 }
   0xa   : > { %s2866_s23 = scalar_select %p1945_p1, 1, 0 }
   0xb   : > { %s2867_s24 = scalar_select %p1949_p2, 1, 0 }
   0xc   : > { %p1955_p4 = por %p1945_p1, %p55_p0  ;;  %p1411_p5 = scmp.ge.s32.totalorder %s1871_s20, 1 }
   0xd   : > { %p1960_p6 = por %p160_p3, %p55_p0  ;;  %p167_p7 = scmp.lt.s32.totalorder %s1871_s20, 3 }
   0xe   : > { %s2868_s25 = scalar_select %p1955_p4, 1, 0 }
   0xf   : > { %s2869_s26 = scalar_select %p1960_p6, 1, 0 }
  0x10   : > { %p1965_p8 = pnand %p1411_p5, %p167_p7  ;;  %s1873_s28 = smov [#allocation5]  }
  0x11   : > { %s179_s29 = sshll.u32 %s1873_s28, 4  ;;  %s33_s5 = sadd.s32 1, %s1867_s19  ;;  %s180_s29 = int_to_ptr.vmem [resolvable:$true] %s179_s29 }
  0x12   : > { %s2870_s27 = scalar_select %p1965_p8, 1, 0 }
  0x13   : > { %p1618_p9 = pneg %p1965_p8  ;;  %s1727_s8 = scalar_lea.hbm %s2858_s1, 2048 }
  0x14   : > { %p1728_p12 = scmp.ne.s32.totalorder %s2858_s1, %s1727_s8  ;;  %p1734_p5 = scmp.lt.u32.totalorder %s1727_s8, %s2858_s1 }
  0x15   : > { %p1974_p11 = pnand %p1618_p9, %p1945_p1 }
  0x17   : > { %p1729_p13 = pneg %p1974_p11 }
  0x19   : > { %p1730_p0 = pnand %p1729_p13, %p1728_p12 }
  0x1b   : > { %p1731_p3 = pneg %p1730_p0 }
  0x1d   : > { %p1736_p7 = pnand %p1734_p5, %p1731_p3 }
  0x1f   : > { %1739 = shalt.err (!%p1736_p7)
}
  0x20   : > { %s1740_s13 = scalar_lea.vmem %s180_s29, 2048  ;;  %p1748_p1 = scmp.lt.s32.totalorder %s180_s29, %s180_s29 }
  0x21   : > { %p1741_p9 = scmp.ne.s32.totalorder %s180_s29, %s1740_s13  ;;  %p1749_p4 = scmp.lt.s32.totalorder %s1740_s13, %s1740_s13 }
  0x23   : > { %p1743_p10 = pnand %p1741_p9, %p1729_p13  ;;  %p1750_p8 = por %p1749_p4, %p1748_p1 }
  0x25   : > { %p1744_p6 = pneg %p1743_p10 }
  0x27   : > { %p1751_p2 = pnand %p1750_p8, %p1744_p6 }
  0x29   : > { %1754 = shalt.err (!%p1751_p2)
}
  0x2a   : > { %s1874_s14 = smov 128   ;;  %s1875_s21 = smov 8  }
  0x2b   : > { %1621 = dma.hbm_to_vmem [thread:$0]  (!%p1974_p11), %s2858_s1, 2048, %s180_s29, [#allocation6], %s1874_s14, %s1874_s14, %s1875_s21  }
  0x2c   : > { %p35_p1 = scmp.ge.s32.totalorder %s33_s5, 2  ;;  %s42_s6 = sadd.s32 1, %s1859_s17 }
  0x2d   : > { %p49_p2 = scmp.ne.s32.totalorder %s1859_s17, %s1855_s16  ;;  %p50_p4 = scmp.eq.s32.totalorder %s1871_s20, 0 }
  0x2e   : > { %s2899_s5 = smov (%p35_p1, %s33_s5), 0  ;;  %p2873_p8 = scmp.ne.s32.totalorder %s2867_s24, 0 }
  0x2f   : > { %p2004_p6 = por %p50_p4, %p49_p2  ;;  %s37_s8 = ssub.s32 %s1867_s19, %s2899_s5 }
  0x30   : > { %p2010_p10 = por %p2873_p8, %p49_p2  ;;  %p1631_p12 = scmp.lt.s32.totalorder %s1871_s20, 2 }
  0x31   : > { %p40_p11 = scmp.eq.s32.totalorder %s37_s8, 0  ;;  %s193_s29 = sand.u32 1, %s1859_s17  }
  0x32   : > { %s1414_s9 = sshll.u32 %s193_s29, 6  ;;  %s1460_s11 = sshll.u32 %s1867_s19, 10 }
  0x33   : > { %s2019_s10 = scalar_select %p40_p11, %s1859_s17, %s42_s6  }
  0x34   : > { %s2025_s22 = scalar_lea.hbm %s2857_s0, %s1460_s11  ;;  %s197_s24 = scalar_lea.vmem [#allocation2], %s1414_s9 }
  0x35   : > { %s206_s28 = sshll.u32 %s197_s24, 4  ;;  %p2031_p13 = pnand %p1631_p12, %p2004_p6  ;;  %s2027_s28 = int_to_ptr.vmem [resolvable:$true] %s206_s28 }
  0x36   : > { %s2035_s6 = scalar_lea.sflag [#allocation3], %s193_s29  ;;  %s1755_s12 = scalar_lea.hbm %s2025_s22, 1024 }
  0x37   : > { %p1756_p0 = scmp.ne.s32.totalorder %s2025_s22, %s1755_s12  ;;  %p1757_p3 = pneg %p2031_p13 }
  0x38   : > { %s1760_s7 = scalar_lea.hbm %s2857_s0, 2048  ;;  %p1761_p9 = scmp.lt.u32.totalorder %s2025_s22, %s2857_s0 }
  0x39   : > { %p1758_p5 = pnand %p1757_p3, %p1756_p0  ;;  %p1762_p1 = scmp.lt.u32.totalorder %s1760_s7, %s1755_s12 }
  0x3a   : > { %p1764_p4 = scmp.lt.u32.totalorder %s1755_s12, %s2025_s22 }
  0x3b   : > { %p1759_p7 = pneg %p1758_p5  ;;  %p1763_p2 = por %p1762_p1, %p1761_p9 }
  0x3d   : > { %p1765_p6 = por %p1764_p4, %p1763_p2 }
  0x3f   : > { %p1766_p8 = pnand %p1765_p6, %p1759_p7 }
  0x41   : > { %1769 = shalt.err (!%p1766_p8)
}
  0x42   : > { %s1770_s29 = scalar_lea.vmem %s2027_s28, 1024  ;;  %s1876_s9 = smov [#allocation2]  }
  0x43   : > { %p1771_p12 = scmp.ne.s32.totalorder %s2027_s28, %s1770_s29  ;;  %s1775_s11 = sshll.u32 %s1876_s9, 4  ;;  %s1776_s11 = int_to_ptr.vmem [resolvable:$false] %s1775_s11 }
  0x44   : > { %s1777_s13 = scalar_lea.vmem %s1776_s11, 2048  ;;  %p1778_p5 = scmp.lt.s32.totalorder %s2027_s28, %s1776_s11 }
  0x45   : > { %p1773_p11 = pnand %p1771_p12, %p1757_p3  ;;  %p1779_p9 = scmp.lt.s32.totalorder %s1777_s13, %s1770_s29 }
  0x47   : > { %p1774_p0 = pneg %p1773_p11  ;;  %p1780_p1 = por %p1779_p9, %p1778_p5 }
  0x49   : > { %p1781_p2 = pnand %p1780_p1, %p1774_p0 }
  0x4b   : > { %1784 = shalt.err (!%p1781_p2)
}
  0x4c   : > { %1625 = dma.hbm_to_vmem [thread:$0]  (!%p2031_p13), %s2025_s22, 1024, %s2027_s28, %s2035_s6, %s1874_s14, %s1874_s14, %s1875_s21  }
  0x4d   : > { %p2876_p3 = scmp.ne.s32.totalorder %s2870_s27, 0 }
  0x4e   : > { %s2069_s12 = sand.u32 (!%p2876_p3), 1, %s1855_s16   ;;  %p2877_p7 = scmp.ne.s32.totalorder (!%p2876_p3), %s2868_s25, 0 }
  0x4f   : > { %230 = sbr.rel (%p2876_p3) target bundleno = 591 (0x24f), region = 36  ;;  %s1418_s7 = sshll.u32 (!%p2876_p3), %s2069_s12, 6 }
  0x50   : > { %s233_s24 = scalar_lea.sflag (!%p2876_p3), [#allocation3], %s2069_s12  ;;  %s2075_s8 = scalar_lea.vmem (!%p2876_p3), [#allocation2], %s1418_s7 }
  0x56   : > { %1838 = dma.done.wait (%p2877_p7), %s233_s24, 1024  }
  0x57   : > { %1840 = vsyncadd (%p2877_p7), %s233_s24, 4294966272  ;;  %p2878_p13 = scmp.ne.s32.totalorder %s2866_s23, 0 }
  0x59   : > { %1842 = dma.done.wait (%p2878_p13), [#allocation6], 2048  }
  0x5a   : > { %1844 = vsyncadd (%p2878_p13), [#allocation6], 4294965248  ;;  %v287_v0 = vld [vmem:[#allocation5] sm:$0xff]  ;;  %v288_v1 = vld [vmem:[#allocation5 + $0x8] sm:$0xff]  ;;  %p272_p4 = scmp.lt.s32.totalorder %s1863_s18, 1  ;;  %s2432_s6 = scalar_lea.vmem [#allocation7], %s1418_s7 }
  0x5b   : > { %v289_v2 = vld [vmem:[#allocation5 + $0x10] sm:$0xff]  ;;  %v1530_v3 = vpack.c.bf16 %v288_v1, %v287_v0  ;;  %v290_v4 = vld [vmem:[#allocation5 + $0x18] sm:$0xff]  ;;  %v291_v6 = vld [vmem:[#allocation5 + $0x20] sm:$0xff]  ;;  %s1461_s29 = sshll.u32 %s1863_s18, 10  ;;  %s1294_s9 = sshll.u32 %s2432_s6, 4  ;;  %s2806_s9 = int_to_ptr.vmem [resolvable:$true] %s1294_s9 }
  0x5c   : > { %v1534_v5 = vpack.c.bf16 %v290_v4, %v289_v2  ;;  %v292_v7 = vld [vmem:[#allocation5 + $0x28] sm:$0xff]  ;;  %v279_v9 = vld [vmem:[%s2075_s8] sm:$0xff]  ;;  %v293_v11 = vld [vmem:[#allocation5 + $0x30] sm:$0xff]  ;;  %s273_s23 = scalar_select %p272_p4, %s1863_s18, 1 }
  0x5d   : > { %1531 = vmatprep.subr.bf16.mxu0 %v1530_v3  ;;  %1562 = vmatprep.subr.bf16.mxu1 %v1530_v3  ;;  %v1538_v8 = vpack.c.bf16 %v292_v7, %v291_v6  ;;  %v283_v10 = vld [vmem:[%s2075_s8 + $0x20] sm:$0xff]  ;;  %v294_v12 = vld [vmem:[#allocation5 + $0x38] sm:$0xff]  ;;  %v296_v15 = vld [vmem:[#allocation5 + $0x48] sm:$0xff]  ;;  %s2804_s7 = scalar_lea.hbm %s2861_s4, %s1461_s29  ;;  %s1279_s18 = scalar_lea.sflag [#allocation4], %s2069_s12 }
  0x5e   : > { %1533 = vmatpush3.bf16.msra.mxu0 %v1530_v3  ;;  %1570 = vmatpush3.bf16.msra.mxu1 %v1530_v3  ;;  %v1542_v13 = vpack.c.bf16 %v294_v12, %v293_v11  ;;  %v295_v14 = vld [vmem:[#allocation5 + $0x40] sm:$0xff]  ;;  %v297_v17 = vld [vmem:[#allocation5 + $0x50] sm:$0xff]  ;;  %v298_v18 = vld [vmem:[#allocation5 + $0x58] sm:$0xff]  ;;  %s2098_s14 = scalar_lea.vmem %s2859_s2, %s273_s23  ;;  %s2103_s28 = scalar_lea.vmem %s2860_s3, %s273_s23 }
  0x5f   : > { %1535 = vmatprep.subr.bf16.mxu0 %v1534_v5  ;;  %1563 = vmatprep.subr.bf16.mxu1 %v1534_v5  ;;  %v1546_v16 = vpack.c.bf16 %v296_v15, %v295_v14  ;;  %v1550_v19 = vpack.c.bf16 %v298_v18, %v297_v17  ;;  %v299_v20 = vld [vmem:[#allocation5 + $0x60] sm:$0xff]  ;;  %v300_v21 = vld [vmem:[#allocation5 + $0x68] sm:$0xff]  ;;  %v301_v23 = vld [vmem:[#allocation5 + $0x70] sm:$0xff]  ;;  %v1878_v17 = vmov 2475754826   ;;  %s1785_s24 = scalar_lea.vmem %s2806_s9, 1024 }
  0x60   : > { %1518 = vmatprep.mubr.f32.mxu0 %v279_v9  ;;  %1524 = vmatprep.mubr.f32.mxu1 %v283_v10  ;;  %v1554_v22 = vpack.c.bf16 %v300_v21, %v299_v20  ;;  %v302_v24 = vld [vmem:[#allocation5 + $0x78] sm:$0xff]  ;;  %v280_v26 = vld [vmem:[%s2075_s8 + $0x8] sm:$0xff]  ;;  %v281_v28 = vld [vmem:[%s2075_s8 + $0x10] sm:$0xff]  ;;  %v1880_v21 = vmov 2102212464   ;;  %p1786_p6 = scmp.ne.s32.totalorder %s2806_s9, %s1785_s24 }
  0x61   : > { %v1558_v25 = vpack.c.bf16 %v302_v24, %v301_v23  ;;  %v284_v27 = vld [vmem:[%s2075_s8 + $0x28] sm:$0xff]  ;;  %v285_v29 = vld [vmem:[%s2075_s8 + $0x30] sm:$0xff]  ;;  %v282_v30 = vld [vmem:[%s2075_s8 + $0x18] sm:$0xff]  ;;  %v1881_v23 = vmov 920167782  }
  0x62   : > { %1537 = vmatpush3.bf16.msra.mxu0 %v1534_v5  ;;  %1571 = vmatpush3.bf16.msra.mxu1 %v1534_v5  ;;  %v286_v31 = vld [vmem:[%s2075_s8 + $0x38] sm:$0xff]  ;;  %v2106_v32 = vld [vmem:[%s2098_s14] ss:$0 sm:$0xff]  ;;  %p1787_p8 = pnand %p1786_p6, %p2010_p10  ;;  %s1883_s8 = smov [#allocation7]  }
  0x63   : > { %1539 = vmatprep.subr.bf16.mxu0 %v1538_v8  ;;  %1564 = vmatprep.subr.bf16.mxu1 %v1538_v8  ;;  %v2109_v34 = vld [vmem:[%s2103_s28] ss:$0 sm:$0xff]  ;;  %s1789_s23 = sshll.u32 %s1883_s8, 4  ;;  %s1790_s23 = int_to_ptr.vmem [resolvable:$false] %s1789_s23 }
  0x64   : > { %p1788_p12 = pneg %p1787_p8  ;;  %s1791_s25 = scalar_lea.vmem %s1790_s23, 2048 }
  0x65   : > { %p1792_p11 = scmp.lt.s32.totalorder %s2806_s9, %s1790_s23  ;;  %p1793_p0 = scmp.lt.s32.totalorder %s1791_s25, %s1785_s24 }
  0x66   : > { %1541 = vmatpush3.bf16.msra.mxu0 %v1538_v8  ;;  %1572 = vmatpush3.bf16.msra.mxu1 %v1538_v8 }
  0x67   : > { %1543 = vmatprep.subr.bf16.mxu0 %v1542_v13  ;;  %1565 = vmatprep.subr.bf16.mxu1 %v1542_v13  ;;  %p1794_p5 = por %p1793_p0, %p1792_p11 }
  0x69   : > { %p1795_p9 = pnand %p1794_p5, %p1788_p12 }
  0x6a   : > { %1545 = vmatpush3.bf16.msra.mxu0 %v1542_v13  ;;  %1573 = vmatpush3.bf16.msra.mxu1 %v1542_v13  ;;  %v1877_v13 = vmov 683565275  }
  0x6b   : > { %1547 = vmatprep.subr.bf16.mxu0 %v1546_v16  ;;  %1566 = vmatprep.subr.bf16.mxu1 %v1546_v16 }
  0x6e   : > { %1549 = vmatpush3.bf16.msra.mxu0 %v1546_v16  ;;  %1574 = vmatpush3.bf16.msra.mxu1 %v1546_v16 }
  0x6f   : > { %1551 = vmatprep.subr.bf16.mxu0 %v1550_v19  ;;  %1567 = vmatprep.subr.bf16.mxu1 %v1550_v19 }
  0x72   : > { %1553 = vmatpush3.bf16.msra.mxu0 %v1550_v19  ;;  %1575 = vmatpush3.bf16.msra.mxu1 %v1550_v19  ;;  %v1879_v19 = vmov 2131351028  }
  0x73   : > { %1555 = vmatprep.subr.bf16.mxu0 %v1554_v22  ;;  %1568 = vmatprep.subr.bf16.mxu1 %v1554_v22 }
  0x76   : > { %1557 = vmatpush3.bf16.msra.mxu0 %v1554_v22  ;;  %1576 = vmatpush3.bf16.msra.mxu1 %v1554_v22 }
  0x77   : > { %1559 = vmatprep.subr.bf16.mxu0 %v1558_v25  ;;  %1569 = vmatprep.subr.bf16.mxu1 %v1558_v25 }
  0x7a   : > { %1561 = vmatpush3.bf16.msra.mxu0 %v1558_v25  ;;  %1577 = vmatpush3.bf16.msra.mxu1 %v1558_v25 }
  0x7d   : > { %1519 = vmatmul.mubr.f32.vlgmr.msra.gmra.mrb[0].mxu0 %v280_v26  ;;  %1525 = vmatmul.mubr.f32.vlgmr.msra.gmra.mrb[0].mxu1 %v284_v27 }
  0x7e   : > { %1521 = vmatprep.mubr.f32.mxu0 %v281_v28  ;;  %1527 = vmatprep.mubr.f32.mxu1 %v285_v29 }
  0x81   : > { %1522 = vmatmul.mubr.f32.gmra.mrb[2].mxu0 %v282_v30  ;;  %1528 = vmatmul.mubr.f32.gmra.mrb[2].mxu1 %v286_v31  ;;  %v1882_v30 = vmov 1326507024  }
 0x150   : > { %v1520_v33 = vpop.f32.mrb[0].mxu0  ;;  %v1526_v35 = vpop.f32.mrb[0].mxu1 }
 0x151   : > { %v416_v36 = vmul.f32 %v1520_v33, %v2106_v32  ;;  %v420_v37 = vmul.f32 %v1526_v35, %v2106_v32  ;;  %v369_v38 = vpop.f32.mrb[1].mxu0  ;;  %v389_v39 = vpop.f32.mrb[1].mxu1 }
 0x152   : > { %v415_v40 = vmul.f32 %v2106_v32, %v369_v38  ;;  %v419_v61 = vmul.f32 %v2106_v32, %v389_v39 }
 0x153   : > { %v2115_v41 = vadd.f32 %v2109_v34, %v416_v36  ;;  %v2118_v42 = vadd.f32 %v2109_v34, %v420_v37 }
 0x154   : > { %v2121_v43 = vadd.f32 %v2109_v34, %v415_v40  ;;  %v2123_v44 = vpop.f32.mrb[2].mxu0  ;;  %v2125_v45 = vpop.f32.mrb[2].mxu1  ;;  %v2143_v7 = vadd.f32 %v2109_v34, %v419_v61 }
 0x155   : > { %v542_v46 = vand.u32 2147483647, %v2115_v41  ;;  %v545_v47 = vand.u32 2139095040, %v2115_v41  ;;  %v2129_v48 = vpop.f32.mrb[3].mxu0  ;;  %v958_v49 = vand.u32 2147483647, %v2118_v42 }
 0x156   : > { %v961_v50 = vand.u32 2139095040, %v2118_v42  ;;  %v441_v55 = vand.u32 2139095040, %v2121_v43  ;;  %v438_v0 = vand.u32 2147483647, %v2121_v43  ;;  %v2140_v2 = vpop.f32.mrb[3].mxu1  ;;  %vm544_vm13 = vcmp.lt.s32.totalorder %v2115_v41, 0 }
 0x157   : > { %v546_v51 = vshrl.u32 %v545_v47, 23  ;;  %v549_v52 = vand.u32 8388607, %v542_v46  ;;  %v965_v54 = vand.u32 8388607, %v958_v49 }
 0x158   : > { %v962_v53 = vshrl.u32 %v961_v50, 23  ;;  %v442_v58 = vshrl.u32 %v441_v55, 23  ;;  %v2151_v10 = vand.u32 8388607, %v438_v0  ;;  %vm2226_vm12 = vcmp.le.f32.partialorder %v542_v46, 0.7853982 }
 0x159   : > { %v1427_v56 = vadd.s32 4294967169, %v546_v51  ;;  %v550_v59 = vor.u32 8388608, %v549_v52  ;;  %v966_v62 = vor.u32 8388608, %v965_v54 }
 0x15a   : > { %v1443_v57 = vadd.s32 4294967169, %v962_v53  ;;  %v1423_v1 = vadd.s32 4294967169, %v442_v58 }
 0x15b   : > { %v552_v60 = vadd.s32 1, %v1427_v56  ;;  %v2145_v8 = vshll.u32 %v550_v59, 8  ;;  %v2147_v9 = vshll.u32 %v966_v62, 8 }
 0x15c   : > { %v968_v63 = vadd.s32 1, %v1443_v57  ;;  %v2153_v11 = vadd.s32 1, %v1423_v1 }
 0x15d   : > { %vm553_vm0 = vcmp.gt.s32.totalorder %v552_v60, 0 }
 0x15e   : > { %v554_v3 = vsel %vm553_vm0, %v552_v60, 0  ;;  %vm969_vm1 = vcmp.gt.s32.totalorder %v968_v63, 0  ;;  %vm449_vm6 = vcmp.gt.s32.totalorder %v2153_v11, 0 }
 0x15f   : > { %v555_v4 = vshrl.u32 %v554_v3, 5  ;;  %v556_v5 = vand.u32 31, %v554_v3  ;;  %v970_v6 = vsel %vm969_vm1, %v968_v63, 0 }
 0x160   : > { %v2156_v15 = vshrl.u32 %v970_v6, 5  ;;  %v972_v16 = vand.u32 31, %v970_v6 }
 0x161   : > { %v557_v12 = vsub.s32 32, %v556_v5  ;;  %v559_v14 = vshll.u32 %v1877_v13, %v556_v5  ;;  %v562_v18 = vshll.u32 %v1878_v17, %v556_v5  ;;  %v565_v20 = vshll.u32 %v1879_v19, %v556_v5 }
 0x162   : > { %v568_v22 = vshll.u32 %v1880_v21, %v556_v5  ;;  %v571_v24 = vshll.u32 %v1881_v23, %v556_v5  ;;  %vm574_vm2 = vcmp.lt.s32.totalorder %v555_v4, 1  ;;  %vm575_vm3 = vcmp.lt.s32.totalorder %v555_v4, 2 }
 0x163   : > { %v560_v25 = vshrl.u32 %v1878_v17, %v557_v12  ;;  %v563_v26 = vshrl.u32 %v1879_v19, %v557_v12  ;;  %v566_v27 = vshrl.u32 %v1880_v21, %v557_v12  ;;  %v558_v28 = vshrl.u32 %v1877_v13, %v557_v12 }
 0x164   : > { %v569_v29 = vshrl.u32 %v1881_v23, %v557_v12  ;;  %v572_v31 = vshrl.u32 %v1882_v30, %v557_v12  ;;  %v973_v37 = vsub.s32 32, %v972_v16  ;;  %vm576_vm4 = vcmp.lt.s32.totalorder %v555_v4, 3 }
 0x165   : > { %v561_v33 = vor.u32 %v560_v25, %v559_v14  ;;  %v564_v35 = vor.u32 %v563_v26, %v562_v18  ;;  %v567_v36 = vor.u32 %v566_v27, %v565_v20  ;;  %vm577_vm5 = vcmp.lt.s32.totalorder %v555_v4, 4 }
 0x166   : > { %v570_v38 = vor.u32 %v569_v29, %v568_v22  ;;  %v573_v39 = vor.u32 %v572_v31, %v571_v24  ;;  %v975_v55 = vshll.u32 %v1877_v13, %v972_v16  ;;  %v976_v58 = vshrl.u32 %v1878_v17, %v973_v37 }
 0x167   : > { %v578_v40 = vsel %vm574_vm2, %v558_v28, %v561_v33  ;;  %v579_v47 = vsel %vm577_vm5, %v567_v36, 2102212464  ;;  %v582_v50 = vsel %vm574_vm2, %v561_v33, %v564_v35  ;;  %v586_v51 = vsel %vm574_vm2, %v564_v35, %v567_v36 }
 0x168   : > { %v580_v52 = vsel %vm576_vm4, %v564_v35, %v579_v47  ;;  %v583_v53 = vsel %vm577_vm5, %v570_v38, 920167782  ;;  %v587_v54 = vsel %vm577_vm5, %v573_v39, 1326507024  ;;  %v978_v59 = vshll.u32 %v1878_v17, %v972_v16 }
 0x169   : > { %v584_v56 = vsel %vm576_vm4, %v567_v36, %v583_v53  ;;  %v588_v57 = vsel %vm576_vm4, %v570_v38, %v587_v54  ;;  %v581_v60 = vsel %vm575_vm3, %v578_v40, %v580_v52  ;;  %v979_v63 = vshrl.u32 %v1879_v19, %v973_v37 }
 0x16a   : > { %v585_v61 = vsel %vm575_vm3, %v582_v50, %v584_v56  ;;  %v589_v62 = vsel %vm575_vm3, %v586_v51, %v588_v57  ;;  %v977_v12 = vor.u32 %v976_v58, %v975_v55  ;;  %v981_v18 = vshll.u32 %v1879_v19, %v972_v16 }
 0x16b   : > { %v2180_v1 = vmul.u32.u64.low %v2145_v8, %v589_v62  ;;  %v2181_v3 = vmul.u32.u64.high %v2145_v8, %v589_v62, %v2180_v1  ;;  %v2184_v5 = vmul.u32.u64.low %v2145_v8, %v585_v61  ;;  %v2185_v6 = vmul.u32.u64.high %v2145_v8, %v585_v61, %v2184_v5 }
 0x16c   : > { %v980_v14 = vor.u32 %v979_v63, %v978_v59  ;;  %v982_v20 = vshrl.u32 %v1880_v21, %v973_v37  ;;  %v974_v22 = vshrl.u32 %v1877_v13, %v973_v37  ;;  %v984_v4 = vshll.u32 %v1880_v21, %v972_v16 }
 0x16d   : > { %v985_v24 = vshrl.u32 %v1881_v23, %v973_v37  ;;  %v988_v25 = vshrl.u32 %v1882_v30, %v973_v37  ;;  %v597_v26 = vmul.u32 %v2145_v8, %v581_v60  ;;  %v987_v28 = vshll.u32 %v1881_v23, %v972_v16 }
 0x16e   : > { %v983_v27 = vor.u32 %v982_v20, %v981_v18  ;;  %vm990_vm7 = vcmp.lt.s32.totalorder %v2156_v15, 1  ;;  %vm599_vm8 = vc.u32 %v2181_v3, %v2184_v5  ;;  %v600_v29 = vadd.s32 1, %v2185_v6 }
 0x16f   : > { %v986_v31 = vor.u32 %v985_v24, %v984_v4  ;;  %vm991_vm9 = vcmp.lt.s32.totalorder %v2156_v15, 2  ;;  %v989_v33 = vor.u32 %v988_v25, %v987_v28  ;;  %vm992_vm10 = vcmp.lt.s32.totalorder %v2156_v15, 3 }
 0x170   : > { %vm993_vm11 = vcmp.lt.s32.totalorder %v2156_v15, 4  ;;  %v998_v35 = vsel %vm990_vm7, %v977_v12, %v980_v14  ;;  %v601_v8 = vsel %vm599_vm8, %v600_v29, %v2185_v6  ;;  %v1002_v16 = vsel %vm990_vm7, %v980_v14, %v983_v27 }
 0x171   : > { %v995_v36 = vsel %vm993_vm11, %v983_v27, 2102212464  ;;  %v999_v37 = vsel %vm993_vm11, %v986_v31, 920167782  ;;  %v602_v38 = vadd.s32 %v601_v8, %v597_v26  ;;  %v994_v39 = vsel %vm990_vm7, %v974_v22, %v977_v12 }
 0x172   : > { %v1000_v40 = vsel %vm992_vm10, %v983_v27, %v999_v37  ;;  %v1003_v47 = vsel %vm993_vm11, %v989_v33, 1326507024  ;;  %v996_v50 = vsel %vm992_vm10, %v980_v14, %v995_v36  ;;  %v450_v53 = vsel %vm449_vm6, %v2153_v11, 0 }
 0x173   : > { %v1001_v51 = vsel %vm991_vm9, %v998_v35, %v1000_v40  ;;  %v1004_v52 = vsel %vm992_vm10, %v986_v31, %v1003_v47  ;;  %v603_v54 = vadd.s32 536870912, %v602_v38  ;;  %v997_v61 = vsel %vm991_vm9, %v994_v39, %v996_v50 }
 0x174   : > { %v1005_v55 = vsel %vm991_vm9, %v1002_v16, %v1004_v52  ;;  %v2210_v56 = vmul.u32.u64.low %v2147_v9, %v1001_v51  ;;  %v2211_v57 = vmul.u32.u64.high %v2147_v9, %v1001_v51, %v2210_v56  ;;  %v452_v62 = vand.u32 31, %v450_v53 }
 0x175   : > { %v2215_v58 = vmul.u32.u64.low %v2147_v9, %v1005_v55  ;;  %v2216_v59 = vmul.u32.u64.high %v2147_v9, %v1005_v55, %v2215_v58  ;;  %v604_v60 = vshrl.u32 %v603_v54, 30  ;;  %v854_v11 = vand.u32 2147483647, %v2143_v7 }
 0x176   : > { %v446_v63 = vor.u32 8388608, %v2151_v10  ;;  %v857_v1 = vand.u32 2139095040, %v2143_v7  ;;  %v1016_v12 = vadd.s32 1, %v2211_v57  ;;  %v453_v14 = vsub.s32 32, %v452_v62 }
 0x177   : > { %v605_v6 = vshll.u32 %v604_v60, 30  ;;  %v1013_v15 = vmul.u32 %v2147_v9, %v997_v61  ;;  %vm1015_vm14 = vc.u32 %v2216_v59, %v2210_v56  ;;  %v628_v20 = vsub.s32 4, %v604_v60 }
 0x178   : > { %v1017_v22 = vsel %vm1015_vm14, %v1016_v12, %v2211_v57  ;;  %v2239_v4 = vand.u32 8388607, %v854_v11  ;;  %v456_v24 = vshrl.u32 %v1878_v17, %v453_v14  ;;  %v2242_v25 = vshll.u32 %v446_v63, 8 }
 0x179   : > { %v2234_v10 = vsub.s32 %v602_v38, %v605_v6  ;;  %v1018_v46 = vadd.s32 %v1017_v22, %v1013_v15  ;;  %v858_v26 = vshrl.u32 %v857_v1, 23  ;;  %v598_v9 = vadd.s32 %v2184_v5, %v2181_v3 }
 0x17a   : > { %v459_v28 = vshrl.u32 %v1879_v19, %v453_v14  ;;  %v462_v29 = vshrl.u32 %v1880_v21, %v453_v14  ;;  %v2248_v33 = vshrl.u32 %v450_v53, 5  ;;  %v455_v35 = vshll.u32 %v1877_v13, %v452_v62 }
 0x17b   : > { %v608_v27 = vsub.s32 0, %v2234_v10  ;;  %v1019_v31 = vadd.s32 536870912, %v1018_v46  ;;  %v458_v8 = vshll.u32 %v1878_v17, %v452_v62  ;;  %v629_v37 = vsel %vm544_vm13, %v628_v20, %v604_v60 }
 0x17c   : > { %v461_v3 = vshll.u32 %v1879_v19, %v452_v62  ;;  %v465_v5 = vshrl.u32 %v1881_v23, %v453_v14  ;;  %v457_v38 = vor.u32 %v456_v24, %v455_v35  ;;  %v464_v39 = vshll.u32 %v1880_v21, %v452_v62 }
 0x17d   : > { %v1428_v36 = vmin.u32 %v608_v27, %v2234_v10  ;;  %v2257_v16 = vshrl.u32 %v1019_v31, 30  ;;  %v468_v40 = vshrl.u32 %v1882_v30, %v453_v14  ;;  %v460_v50 = vor.u32 %v459_v28, %v458_v8 }
 0x17e   : > { %v463_v51 = vor.u32 %v462_v29, %v461_v3  ;;  %v467_v52 = vshll.u32 %v1881_v23, %v452_v62  ;;  %v466_v54 = vor.u32 %v465_v5, %v464_v39  ;;  %vm470_vm15 = vcmp.lt.s32.totalorder %v2248_v33, 1 }
 0x17f   : > { %v610_v47 = vclz %v1428_v36  ;;  %v1021_v53 = vshll.u32 %v2257_v16, 30  ;;  %v1439_v55 = vadd.s32 4294967169, %v858_v26  ;;  %v631_v58 = vsel %vm2226_vm12, 0, %v629_v37 }
 0x180   : > { %v469_v60 = vor.u32 %v468_v40, %v467_v52  ;;  %vm473_vm0 = vcmp.lt.s32.totalorder %v2248_v33, 4  ;;  %vm471_vm1 = vcmp.lt.s32.totalorder %v2248_v33, 2  ;;  %vm472_vm2 = vcmp.lt.s32.totalorder %v2248_v33, 3 }
 0x181   : > { %v1429_v57 = vadd.s32 4294967294, %v610_v47  ;;  %v2267_v61 = vsub.s32 %v1018_v46, %v1021_v53  ;;  %v479_v62 = vsel %vm473_vm0, %v466_v54, 920167782  ;;  %v454_v63 = vshrl.u32 %v1877_v13, %v453_v14 }
 0x182   : > { %v478_v1 = vsel %vm470_vm15, %v457_v38, %v460_v50  ;;  %v480_v6 = vsel %vm472_vm2, %v463_v51, %v479_v62  ;;  %v635_v15 = vadd.s32 3, %v631_v58  ;;  %v482_v22 = vsel %vm470_vm15, %v460_v50, %v463_v51 }
 0x183   : > { %vm1430_vm3 = vcmp.lt.s32.totalorder %v1429_v57, 0  ;;  %v1024_v20 = vsub.s32 0, %v2267_v61  ;;  %vm960_vm4 = vcmp.lt.s32.totalorder %v2118_v42, 0  ;;  %v475_v14 = vsel %vm473_vm0, %v463_v51, 2102212464 }
 0x184   : > { %v613_v12 = vsel %vm1430_vm3, 0, %v1429_v57  ;;  %v483_v26 = vsel %vm473_vm0, %v469_v60, 1326507024  ;;  %v481_v29 = vsel %vm471_vm1, %v478_v1, %v480_v6  ;;  %v864_v37 = vadd.s32 1, %v1439_v55 }
 0x185   : > { %v614_v46 = vsub.s32 32, %v613_v12  ;;  %v618_v24 = vsub.s32 4294967266, %v613_v12  ;;  %v615_v27 = vshll.u32 %v2234_v10, %v613_v12  ;;  %v1444_v28 = vmin.u32 %v1024_v20, %v2267_v61 }
 0x186   : > { %v484_v31 = vsel %vm472_vm2, %v466_v54, %v483_v26  ;;  %v1044_v5 = vsub.s32 4, %v2257_v16  ;;  %v474_v10 = vsel %vm470_vm15, %v454_v63, %v457_v38  ;;  %v476_v39 = vsel %vm472_vm2, %v460_v50, %v475_v14 }
 0x187   : > { %v616_v35 = vshrl.u32 %v598_v9, %v614_v46  ;;  %v619_v8 = vadd.s32 127, %v618_v24  ;;  %v485_v36 = vsel %vm471_vm1, %v482_v22, %v484_v31  ;;  %v1026_v3 = vclz %v1444_v28 }
 0x188   : > { %v2300_v51 = vmul.u32.u64.low %v2242_v25, %v485_v36  ;;  %v2301_v52 = vmul.u32.u64.high %v2242_v25, %v485_v36, %v2300_v51  ;;  %v2304_v53 = vmul.u32.u64.low %v2242_v25, %v481_v29  ;;  %v2305_v54 = vmul.u32.u64.high %v2242_v25, %v481_v29, %v2304_v53 }
 0x189   : > { %v617_v40 = vor.u32 %v616_v35, %v615_v27  ;;  %v620_v47 = vshll.u32 %v619_v8, 23  ;;  %v1445_v9 = vadd.s32 4294967294, %v1026_v3  ;;  %vm865_vm5 = vcmp.gt.s32.totalorder %v864_v37, 0 }
 0x18a   : > { %v1014_v38 = vadd.s32 %v2210_v56, %v2216_v59  ;;  %v862_v57 = vor.u32 8388608, %v2239_v4  ;;  %v866_v50 = vsel %vm865_vm5, %v864_v37, 0  ;;  %v2311_v58 = vand.u32 3, %v635_v15 }
 0x18b   : > { %v621_v55 = vor.u32 4788187, %v620_v47  ;;  %vm1446_vm6 = vcmp.lt.s32.totalorder %v1445_v9, 0  ;;  %v477_v60 = vsel %vm471_vm1, %v474_v10, %v476_v39  ;;  %v868_v62 = vand.u32 31, %v866_v50 }
 0x18c   : > { %v624_v1 = vcvt.s32.f32 %v617_v40  ;;  %v1029_v6 = vsel %vm1446_vm6, 0, %v1445_v9  ;;  %vm495_vm7 = vc.u32 %v2301_v52, %v2304_v53  ;;  %v2320_v56 = vsel %vm960_vm4, %v1044_v5, %v2257_v16 }
 0x18d   : > { %v622_v63 = vand.u32 2147483647, %v621_v55  ;;  %v1030_v12 = vsub.s32 32, %v1029_v6  ;;  %v1034_v20 = vsub.s32 4294967266, %v1029_v6  ;;  %v496_v59 = vadd.s32 1, %v2305_v54 }
 0x18e   : > { %v493_v33 = vmul.u32 %v2242_v25, %v477_v60  ;;  %v2324_v15 = vshrl.u32 %v866_v50, 5  ;;  %v869_v22 = vsub.s32 32, %v868_v62  ;;  %v1031_v46 = vshll.u32 %v2267_v61, %v1029_v6 }
 0x18f   : > { %v625_v4 = vmul.f32 %v624_v1, %v622_v63  ;;  %v1032_v24 = vshrl.u32 %v1014_v38, %v1030_v12  ;;  %v1035_v14 = vadd.s32 127, %v1034_v20  ;;  %v497_v26 = vsel %vm495_vm7, %v496_v59, %v2305_v54 }
 0x190   : > { %v498_v28 = vadd.s32 %v497_v26, %v493_v33  ;;  %v871_v29 = vshll.u32 %v1877_v13, %v868_v62  ;;  %v872_v16 = vshrl.u32 %v1878_v17, %v869_v22  ;;  %v874_v8 = vshll.u32 %v1878_v17, %v868_v62 }
 0x191   : > { %v626_v27 = vxor.u32 2147483648, %v625_v4  ;;  %v1033_v31 = vor.u32 %v1032_v24, %v1031_v46  ;;  %v1036_v35 = vshll.u32 %v1035_v14, 23  ;;  %v875_v25 = vshrl.u32 %v1879_v19, %v869_v22 }
 0x192   : > { %v499_v61 = vadd.s32 536870912, %v498_v28  ;;  %v877_v37 = vshll.u32 %v1879_v19, %v868_v62  ;;  %v878_v3 = vshrl.u32 %v1880_v21, %v869_v22  ;;  %v873_v39 = vor.u32 %v872_v16, %v871_v29 }
 0x193   : > { %v627_v36 = vsel %vm544_vm13, %v626_v27, %v625_v4  ;;  %v1037_v10 = vor.u32 4788187, %v1036_v35  ;;  %v880_v40 = vshll.u32 %v1880_v21, %v868_v62  ;;  %v1040_v47 = vcvt.s32.f32 %v1033_v31 }
 0x194   : > { %v630_v5 = vsel %vm2226_vm12, %v2115_v41, %v627_v36  ;;  %v2340_v51 = vshrl.u32 %v499_v61, 30  ;;  %v881_v9 = vshrl.u32 %v1881_v23, %v869_v22  ;;  %v876_v55 = vor.u32 %v875_v25, %v874_v8 }
 0x195   : > { %1693 = vcosq.f32 %v630_v5  ;;  %v1038_v54 = vand.u32 2147483647, %v1037_v10  ;;  %v884_v38 = vshrl.u32 %v1882_v30, %v869_v22  ;;  %vm2347_vm8 = vcmp.le.f32.partialorder %v958_v49, 0.7853982 }
 0x196   : > { %1695 = vsinq.f32 %v630_v5  ;;  %v501_v50 = vshll.u32 %v2340_v51, 30  ;;  %v882_v60 = vor.u32 %v881_v9, %v880_v40  ;;  %v879_v1 = vor.u32 %v878_v3, %v877_v37 }
 0x197   : > { %v1041_v63 = vmul.f32 %v1040_v47, %v1038_v54  ;;  %v883_v6 = vshll.u32 %v1881_v23, %v868_v62  ;;  %vm641_vm9 = vcmp.eq.s32.totalorder %v2311_v58, 2  ;;  %v1047_v12 = vsel %vm2347_vm8, 0, %v2320_v56 }
 0x198   : > { %v2356_v20 = vsub.s32 %v498_v28, %v501_v50  ;;  %vm886_vm10 = vcmp.lt.s32.totalorder %v2324_v15, 1  ;;  %v2359_v59 = vshll.u32 %v862_v57, 8  ;;  %vm638_vm11 = vcmp.eq.s32.totalorder %v2311_v58, 0 }
 0x199   : > { %v1042_v49 = vxor.u32 2147483648, %v1041_v63  ;;  %v885_v4 = vor.u32 %v884_v38, %v883_v6  ;;  %vm889_vm12 = vcmp.lt.s32.totalorder %v2324_v15, 4  ;;  %v894_v62 = vsel %vm886_vm10, %v873_v39, %v876_v55 }
 0x19a   : > { %vm637_vm13 = vcmp.lt.s32.totalorder %v2311_v58, 2  ;;  %v504_v33 = vsub.s32 0, %v2356_v20  ;;  %v870_v56 = vshrl.u32 %v1877_v13, %v869_v22  ;;  %vm888_vm14 = vcmp.lt.s32.totalorder %v2324_v15, 3 }
 0x19b   : > { %v895_v57 = vsel %vm889_vm12, %v882_v60, 920167782  ;;  %vm634_vm15 = vweird.f32 %v2115_v41  ;;  %v1043_v46 = vsel %vm960_vm4, %v1042_v49, %v1041_v63  ;;  %vm440_vm0 = vcmp.lt.s32.totalorder %v2121_v43, 0 }
 0x19c   : > { %vm887_vm1 = vcmp.lt.s32.totalorder %v2324_v15, 2  ;;  %v891_v24 = vsel %vm889_vm12, %v879_v1, 2102212464  ;;  %v896_v22 = vsel %vm888_vm14, %v879_v1, %v895_v57  ;;  %v1046_v14 = vsel %vm2347_vm8, %v2118_v42, %v1043_v46 }
 0x19d   : > { %v1424_v26 = vmin.u32 %v504_v33, %v2356_v20  ;;  %v897_v27 = vsel %vm887_vm1, %v894_v62, %v896_v22  ;;  %v898_v28 = vsel %vm886_vm10, %v876_v55, %v879_v1  ;;  %1697 = vcosq.f32 %v1046_v14 }
 0x19e   : > { %v899_v29 = vsel %vm889_vm12, %v885_v4, 1326507024  ;;  %v2391_v16 = vmul.u32.u64.low %v2359_v59, %v897_v27  ;;  %v2392_v31 = vmul.u32.u64.high %v2359_v59, %v897_v27, %v2391_v16  ;;  %1699 = vsinq.f32 %v1046_v14 }
 0x19f   : > { %v1694_v35 = vpop.eup %1693  ;;  %v506_v8 = vclz %v1424_v26  ;;  %v890_v25 = vsel %vm886_vm10, %v870_v56, %v873_v39  ;;  %v892_v36 = vsel %vm888_vm14, %v876_v55, %v891_v24  ;;  %v1051_v3 = vadd.s32 3, %v1047_v12 }
 0x1a0   : > { %v1696_v61 = vpop.eup %1695  ;;  %v642_v37 = vxor.u32 2147483648, %v1694_v35  ;;  %v524_v5 = vsub.s32 4, %v2340_v51  ;;  %v900_v10 = vsel %vm888_vm14, %v882_v60, %v899_v29  ;;  %v418_v54 = vmul.f32 %v2123_v44, %v2106_v32 }
 0x1a1   : > { %v639_v40 = vxor.u32 2147483648, %v1696_v61  ;;  %v1425_v47 = vadd.s32 4294967294, %v506_v8  ;;  %v901_v9 = vsel %vm887_vm1, %v898_v28, %v900_v10  ;;  %v893_v55 = vsel %vm887_vm1, %v890_v25, %v892_v36 }
 0x1a2   : > { %v643_v39 = vsel %vm641_vm9, %v642_v37, %v1696_v61  ;;  %v2411_v38 = vmul.u32.u64.low %v2359_v59, %v901_v9  ;;  %v2412_v50 = vmul.u32.u64.high %v2359_v59, %v901_v9, %v2411_v38  ;;  %v912_v18 = vadd.s32 1, %v2392_v31 }
 0x1a3   : > { %v640_v60 = vsel %vm638_vm11, %v1694_v35, %v639_v40  ;;  %vm1426_vm2 = vcmp.lt.s32.totalorder %v1425_v47, 0  ;;  %v2418_v63 = vadd.f32 %v2109_v34, %v418_v54  ;;  %v1052_v1 = vand.u32 3, %v1051_v3 }
 0x1a4   : > { %v644_v44 = vsel %vm637_vm13, %v640_v60, %v643_v39  ;;  %v494_v15 = vadd.s32 %v2304_v53, %v2301_v52  ;;  %v509_v6 = vsel %vm1426_vm2, 0, %v1425_v47  ;;  %vm1050_vm3 = vweird.f32 %v2118_v42 }
 0x1a5   : > { %v645_v12 = vsel %vm634_vm15, nan, %v644_v44  ;;  %v510_v49 = vsub.s32 32, %v509_v6  ;;  %v514_v4 = vsub.s32 4294967266, %v509_v6  ;;  %v525_v62 = vsel %vm440_vm0, %v524_v5, %v2340_v51 }
 0x1a6   : > { %1271 = vst [vmem:[%s2432_s6 + $0x8] sm:$0xff] %v645_v12  ;;  %v511_v58 = vshll.u32 %v2356_v20, %v509_v6  ;;  %v909_v52 = vmul.u32 %v2359_v59, %v893_v55  ;;  %vm911_vm4 = vc.u32 %v2412_v50, %v2391_v16  ;;  %v750_v41 = vand.u32 2147483647, %v2418_v63 }
 0x1a7   : > { %v512_v53 = vshrl.u32 %v494_v15, %v510_v49  ;;  %v515_v33 = vadd.s32 127, %v514_v4  ;;  %v913_v56 = vsel %vm911_vm4, %v912_v18, %v2392_v31  ;;  %v753_v51 = vand.u32 2139095040, %v2418_v63  ;;  %v1698_v57 = vpop.eup %1697 }
 0x1a8   : > { %vm1054_vm5 = vcmp.eq.s32.totalorder %v1052_v1, 0  ;;  %vm2444_vm6 = vcmp.le.f32.partialorder %v438_v0, 0.7853982  ;;  %v914_v20 = vadd.s32 %v913_v56, %v909_v52  ;;  %v422_v59 = vmul.f32 %v2125_v45, %v2106_v32  ;;  %v1700_v24 = vpop.eup %1699 }
 0x1a9   : > { %v1058_v22 = vxor.u32 2147483648, %v1698_v57  ;;  %v513_v14 = vor.u32 %v512_v53, %v511_v58  ;;  %v516_v26 = vshll.u32 %v515_v33, 23  ;;  %v754_v27 = vshrl.u32 %v753_v51, 23 }
 0x1aa   : > { %v1055_v28 = vxor.u32 2147483648, %v1700_v24  ;;  %vm1057_vm7 = vcmp.eq.s32.totalorder %v1052_v1, 2  ;;  %v527_v29 = vsel %vm2444_vm6, 0, %v525_v62  ;;  %v915_v31 = vadd.s32 536870912, %v914_v20 }
 0x1ab   : > { %v1059_v35 = vsel %vm1057_vm7, %v1058_v22, %v1700_v24  ;;  %v517_v0 = vor.u32 4788187, %v516_v26  ;;  %v1435_v8 = vadd.s32 4294967169, %v754_v27  ;;  %v757_v25 = vand.u32 8388607, %v750_v41 }
 0x1ac   : > { %vm1053_vm8 = vcmp.lt.s32.totalorder %v1052_v1, 2  ;;  %v1056_v45 = vsel %vm1054_vm5, %v1698_v57, %v1055_v28  ;;  %v916_v36 = vshrl.u32 %v915_v31, 30  ;;  %v2456_v61 = vadd.f32 %v2109_v34, %v422_v59 }
 0x1ad   : > { %v1060_v37 = vsel %vm1053_vm8, %v1056_v45, %v1059_v35  ;;  %v518_v3 = vand.u32 2147483647, %v517_v0  ;;  %v520_v5 = vcvt.s32.f32 %v513_v14  ;;  %v760_v10 = vadd.s32 1, %v1435_v8 }
 0x1ae   : > { %v1061_v40 = vsel %vm1050_vm3, nan, %v1060_v37  ;;  %v531_v47 = vadd.s32 3, %v527_v29  ;;  %v917_v9 = vshll.u32 %v916_v36, 30  ;;  %v940_v54 = vsub.s32 4, %v916_v36 }
 0x1af   : > { %1275 = vst [vmem:[%s2432_s6 + $0x28] sm:$0xff] %v1061_v40  ;;  %v521_v39 = vmul.f32 %v520_v5, %v518_v3  ;;  %v758_v55 = vor.u32 8388608, %v757_v25  ;;  %vm761_vm9 = vcmp.gt.s32.totalorder %v760_v10, 0  ;;  %vm856_vm10 = vcmp.lt.s32.totalorder %v2143_v7, 0 }
 0x1b0   : > { %v2462_v38 = vsub.s32 %v914_v20, %v917_v9  ;;  %v762_v34 = vsel %vm761_vm9, %v760_v10, 0  ;;  %v1166_v60 = vand.u32 2147483647, %v2456_v61  ;;  %v2467_v44 = vsel %vm856_vm10, %v940_v54, %v916_v36 }
 0x1b1   : > { %v522_v18 = vxor.u32 2147483648, %v521_v39  ;;  %v764_v42 = vand.u32 31, %v762_v34  ;;  %v2469_v1 = vand.u32 3, %v531_v47  ;;  %vm2473_vm11 = vcmp.le.f32.partialorder %v854_v11, 0.7853982 }
 0x1b2   : > { %v920_v6 = vsub.s32 0, %v2462_v38  ;;  %v1169_v12 = vand.u32 2139095040, %v2456_v61  ;;  %v910_v4 = vadd.s32 %v2391_v16, %v2412_v50  ;;  %v2483_v58 = vshll.u32 %v758_v55, 8 }
 0x1b3   : > { %v523_v49 = vsel %vm440_vm0, %v522_v18, %v521_v39  ;;  %v765_v62 = vsub.s32 32, %v764_v42  ;;  %v943_v53 = vsel %vm2473_vm11, 0, %v2467_v44  ;;  %v2494_v33 = vand.u32 8388607, %v1166_v60 }
 0x1b4   : > { %v526_v11 = vsel %vm2444_vm6, %v2121_v43, %v523_v49  ;;  %v1440_v52 = vmin.u32 %v920_v6, %v2462_v38  ;;  %v763_v56 = vshrl.u32 %v762_v34, 5  ;;  %v767_v57 = vshll.u32 %v1877_v13, %v764_v42 }
 0x1b5   : > { %1701 = vcosq.f32 %v526_v11  ;;  %v768_v16 = vshrl.u32 %v1878_v17, %v765_v62  ;;  %v771_v50 = vshrl.u32 %v1879_v19, %v765_v62  ;;  %v1170_v46 = vshrl.u32 %v1169_v12, 23 }
 0x1b6   : > { %1703 = vsinq.f32 %v526_v11  ;;  %v922_v51 = vclz %v1440_v52  ;;  %v766_v20 = vshrl.u32 %v1877_v13, %v765_v62  ;;  %v770_v59 = vshll.u32 %v1878_v17, %v764_v42 }
 0x1b7   : > { %v773_v24 = vshll.u32 %v1879_v19, %v764_v42  ;;  %v774_v22 = vshrl.u32 %v1880_v21, %v765_v62  ;;  %v769_v26 = vor.u32 %v768_v16, %v767_v57  ;;  %v776_v27 = vshll.u32 %v1880_v21, %v764_v42 }
 0x1b8   : > { %v1441_v14 = vadd.s32 4294967294, %v922_v51  ;;  %v777_v28 = vshrl.u32 %v1881_v23, %v765_v62  ;;  %vm537_vm12 = vcmp.eq.s32.totalorder %v2469_v1, 2  ;;  %v772_v29 = vor.u32 %v771_v50, %v770_v59 }
 0x1b9   : > { %v775_v31 = vor.u32 %v774_v22, %v773_v24  ;;  %v779_v35 = vshll.u32 %v1881_v23, %v764_v42  ;;  %v780_v0 = vshrl.u32 %v1882_v30, %v765_v62  ;;  %vm534_vm13 = vcmp.eq.s32.totalorder %v2469_v1, 0 }
 0x1ba   : > { %vm1442_vm14 = vcmp.lt.s32.totalorder %v1441_v14, 0  ;;  %v778_v8 = vor.u32 %v777_v28, %v776_v27  ;;  %vm782_vm15 = vcmp.lt.s32.totalorder %v763_v56, 1  ;;  %vm783_vm0 = vcmp.lt.s32.totalorder %v763_v56, 2 }
 0x1bb   : > { %vm533_vm1 = vcmp.lt.s32.totalorder %v2469_v1, 2  ;;  %v925_v25 = vsel %vm1442_vm14, 0, %v1441_v14  ;;  %v781_v45 = vor.u32 %v780_v0, %v779_v35  ;;  %vm784_vm2 = vcmp.lt.s32.totalorder %v763_v56, 3 }
 0x1bc   : > { %vm785_vm3 = vcmp.lt.s32.totalorder %v763_v56, 4  ;;  %vm530_vm4 = vweird.f32 %v2121_v43  ;;  %v926_v36 = vsub.s32 32, %v925_v25  ;;  %v930_v37 = vsub.s32 4294967266, %v925_v25 }
 0x1bd   : > { %v786_v3 = vsel %vm782_vm15, %v766_v20, %v769_v26  ;;  %v787_v5 = vsel %vm785_vm3, %v775_v31, 2102212464  ;;  %v927_v10 = vshll.u32 %v2462_v38, %v925_v25  ;;  %v790_v40 = vsel %vm782_vm15, %v769_v26, %v772_v29 }
 0x1be   : > { %v791_v47 = vsel %vm785_vm3, %v778_v8, 920167782  ;;  %v794_v9 = vsel %vm782_vm15, %v772_v29, %v775_v31  ;;  %v928_v54 = vshrl.u32 %v910_v4, %v926_v36  ;;  %v931_v39 = vadd.s32 127, %v930_v37 }
 0x1bf   : > { %v792_v55 = vsel %vm784_vm2, %v775_v31, %v791_v47  ;;  %v795_v34 = vsel %vm785_vm3, %v781_v45, 1326507024  ;;  %v1702_v18 = vpop.eup %1701  ;;  %v788_v44 = vsel %vm784_vm2, %v772_v29, %v787_v5  ;;  %v1451_v12 = vadd.s32 4294967169, %v1170_v46 }
 0x1c0   : > { %v793_v42 = vsel %vm783_vm0, %v790_v40, %v792_v55  ;;  %v796_v6 = vsel %vm784_vm2, %v778_v8, %v795_v34  ;;  %v1704_v49 = vpop.eup %1703  ;;  %v538_v62 = vxor.u32 2147483648, %v1702_v18  ;;  %v929_v11 = vor.u32 %v928_v54, %v927_v10 }
 0x1c1   : > { %v932_v38 = vshll.u32 %v931_v39, 23  ;;  %v797_v52 = vsel %vm783_vm0, %v794_v9, %v796_v6  ;;  %v535_v16 = vxor.u32 2147483648, %v1704_v49  ;;  %v1176_v51 = vadd.s32 1, %v1451_v12 }
 0x1c2   : > { %v2518_v4 = vmul.u32.u64.low %v2483_v58, %v797_v52  ;;  %v2519_v50 = vmul.u32.u64.high %v2483_v58, %v797_v52, %v2518_v4  ;;  %v539_v57 = vsel %vm537_vm12, %v538_v62, %v1704_v49  ;;  %v947_v59 = vadd.s32 3, %v943_v53 }
 0x1c3   : > { %v933_v20 = vor.u32 4788187, %v932_v38  ;;  %v789_v46 = vsel %vm783_vm0, %v786_v3, %v788_v44  ;;  %v536_v24 = vsel %vm534_vm13, %v1702_v18, %v535_v16  ;;  %vm1177_vm5 = vcmp.gt.s32.totalorder %v1176_v51, 0 }
 0x1c4   : > { %v2527_v22 = vmul.u32.u64.low %v2483_v58, %v793_v42  ;;  %v2528_v14 = vmul.u32.u64.high %v2483_v58, %v793_v42, %v2527_v22  ;;  %v540_v26 = vsel %vm533_vm1, %v536_v24, %v539_v57  ;;  %v936_v28 = vcvt.s32.f32 %v929_v11 }
 0x1c5   : > { %v934_v27 = vand.u32 2147483647, %v933_v20  ;;  %v1178_v29 = vsel %vm1177_vm5, %v1176_v51, 0  ;;  %v541_v53 = vsel %vm530_vm4, nan, %v540_v26  ;;  %v417_v0 = vmul.f32 %v2106_v32, %v2129_v48 }
 0x1c6   : > { %v2535_v56 = vshrl.u32 %v1178_v29, 5  ;;  %1270 = vst [vmem:[%s2432_s6] sm:$0xff] %v541_v53  ;;  %vm807_vm6 = vc.u32 %v2519_v50, %v2527_v22  ;;  %v1180_v35 = vand.u32 31, %v1178_v29  ;;  %v2542_v8 = vand.u32 3, %v947_v59  ;;  %v1725_v59 = vld [vmem:[%s2103_s28] ss:$0 sm:$0xff] }
 0x1c7   : > { %v937_v31 = vmul.f32 %v936_v28, %v934_v27  ;;  %v805_v1 = vmul.u32 %v2483_v58, %v789_v46  ;;  %v808_v25 = vadd.s32 1, %v2528_v14  ;;  %v1174_v43 = vor.u32 8388608, %v2494_v33 }
 0x1c8   : > { %v1181_v36 = vsub.s32 32, %v1180_v35  ;;  %v1183_v37 = vshll.u32 %v1877_v13, %v1180_v35  ;;  %vm1198_vm7 = vcmp.lt.s32.totalorder %v2535_v56, 1  ;;  %v1186_v5 = vshll.u32 %v1878_v17, %v1180_v35 }
 0x1c9   : > { %v938_v45 = vxor.u32 2147483648, %v937_v31  ;;  %v809_v3 = vsel %vm807_vm6, %v808_v25, %v2528_v14  ;;  %v1189_v32 = vshll.u32 %v1879_v19, %v1180_v35  ;;  %v1192_v48 = vshll.u32 %v1880_v21, %v1180_v35 }
 0x1ca   : > { %v810_v10 = vadd.s32 %v809_v3, %v805_v1  ;;  %v1184_v33 = vshrl.u32 %v1878_v17, %v1181_v36  ;;  %v1195_v40 = vshll.u32 %v1881_v23, %v1180_v35  ;;  %v1187_v9 = vshrl.u32 %v1879_v19, %v1181_v36 }
 0x1cb   : > { %v939_v58 = vsel %vm856_vm10, %v938_v45, %v937_v31  ;;  %v1190_v54 = vshrl.u32 %v1880_v21, %v1181_v36  ;;  %v1193_v39 = vshrl.u32 %v1881_v23, %v1181_v36  ;;  %v1196_v18 = vshrl.u32 %v1882_v30, %v1181_v36  ;;  %v1726_v45 = vld [vmem:[%s2098_s14] ss:$0 sm:$0xff] }
 0x1cc   : > { %v942_v47 = vsel %vm2473_vm11, %v2143_v7, %v939_v58  ;;  %v811_v55 = vadd.s32 536870912, %v810_v10  ;;  %v1185_v34 = vor.u32 %v1184_v33, %v1183_v37  ;;  %v1188_v44 = vor.u32 %v1187_v9, %v1186_v5 }
 0x1cd   : > { %1705 = vcosq.f32 %v942_v47  ;;  %v1191_v42 = vor.u32 %v1190_v54, %v1189_v32  ;;  %v1194_v6 = vor.u32 %v1193_v39, %v1192_v48  ;;  %v1197_v49 = vor.u32 %v1196_v18, %v1195_v40 }
 0x1ce   : > { %1707 = vsinq.f32 %v942_v47  ;;  %v812_v12 = vshrl.u32 %v811_v55, 30  ;;  %vm1199_vm8 = vcmp.lt.s32.totalorder %v2535_v56, 2  ;;  %vm1201_vm9 = vcmp.lt.s32.totalorder %v2535_v56, 4 }
 0x1cf   : > { %v1182_v15 = vshrl.u32 %v1877_v13, %v1181_v36  ;;  %vm1200_vm10 = vcmp.lt.s32.totalorder %v2535_v56, 3  ;;  %v1206_v62 = vsel %vm1198_vm7, %v1185_v34, %v1188_v44  ;;  %v1207_v11 = vsel %vm1201_vm9, %v1194_v6, 920167782 }
 0x1d0   : > { %v813_v38 = vshll.u32 %v812_v12, 30  ;;  %v1203_v52 = vsel %vm1201_vm9, %v1191_v42, 2102212464  ;;  %v1208_v16 = vsel %vm1200_vm10, %v1191_v42, %v1207_v11  ;;  %v1210_v4 = vsel %vm1198_vm7, %v1188_v44, %v1191_v42 }
 0x1d1   : > { %v1209_v51 = vsel %vm1199_vm8, %v1206_v62, %v1208_v16  ;;  %v1211_v57 = vsel %vm1201_vm9, %v1197_v49, 1326507024  ;;  %v1214_v20 = vshll.u32 %v1174_v43, 8  ;;  %v2577_v46 = vadd.f32 %v1725_v59, %v417_v0 }
 0x1d2   : > { %v2579_v24 = vsub.s32 %v810_v10, %v813_v38  ;;  %v836_v14 = vsub.s32 4, %v812_v12  ;;  %v1202_v26 = vsel %vm1198_vm7, %v1182_v15, %v1185_v34  ;;  %v1212_v27 = vsel %vm1200_vm10, %v1194_v6, %v1211_v57 }
 0x1d3   : > { %v1204_v28 = vsel %vm1200_vm10, %v1188_v44, %v1203_v52  ;;  %v1213_v29 = vsel %vm1199_vm8, %v1210_v4, %v1212_v27  ;;  %v2589_v53 = vmul.u32.u64.low %v1214_v20, %v1209_v51  ;;  %v2590_v31 = vmul.u32.u64.high %v1214_v20, %v1209_v51, %v2589_v53 }
 0x1d4   : > { %vm946_vm11 = vweird.f32 %v2143_v7  ;;  %v816_v35 = vsub.s32 0, %v2579_v24  ;;  %v2594_v0 = vmul.u32.u64.low %v1214_v20, %v1213_v29  ;;  %v2595_v1 = vmul.u32.u64.high %v1214_v20, %v1213_v29, %v2594_v0 }
 0x1d5   : > { %vm2599_vm12 = vcmp.le.f32.partialorder %v750_v41, 0.7853982  ;;  %vm752_vm13 = vcmp.lt.s32.totalorder %v2418_v63, 0  ;;  %v649_v43 = vand.u32 2139095040, %v2577_v46  ;;  %v421_v36 = vmul.f32 %v1726_v45, %v2140_v2 }
 0x1d6   : > { %vm949_vm14 = vcmp.lt.s32.totalorder %v2542_v8, 2  ;;  %v1436_v3 = vmin.u32 %v816_v35, %v2579_v24  ;;  %v837_v5 = vsel %vm752_vm13, %v836_v14, %v812_v12  ;;  %v1205_v41 = vsel %vm1199_vm8, %v1202_v26, %v1204_v28 }
 0x1d7   : > { %v1706_v37 = vpop.eup %1705  ;;  %v1224_v58 = vadd.s32 1, %v2590_v31  ;;  %v646_v10 = vand.u32 2147483647, %v2577_v46  ;;  %v650_v33 = vshrl.u32 %v649_v43, 23  ;;  %vm950_vm15 = vcmp.eq.s32.totalorder %v2542_v8, 0 }
 0x1d8   : > { %v1708_v32 = vpop.eup %1707  ;;  %v954_v48 = vxor.u32 2147483648, %v1706_v37  ;;  %vm953_vm0 = vcmp.eq.s32.totalorder %v2542_v8, 2  ;;  %v818_v40 = vclz %v1436_v3  ;;  %v839_v9 = vsel %vm2599_vm12, 0, %v837_v5 }
 0x1d9   : > { %v951_v2 = vxor.u32 2147483648, %v1708_v32  ;;  %v1221_v56 = vmul.u32 %v1214_v20, %v1205_v41  ;;  %vm1223_vm1 = vc.u32 %v2595_v1, %v2589_v53  ;;  %v1431_v34 = vadd.s32 4294967169, %v650_v33 }
 0x1da   : > { %v955_v47 = vsel %vm953_vm0, %v954_v48, %v1708_v32  ;;  %v1437_v39 = vadd.s32 4294967294, %v818_v40  ;;  %v1225_v55 = vsel %vm1223_vm1, %v1224_v58, %v2590_v31  ;;  %v653_v42 = vand.u32 8388607, %v646_v10 }
 0x1db   : > { %v952_v54 = vsel %vm950_vm15, %v1706_v37, %v951_v2  ;;  %v1226_v44 = vadd.s32 %v1225_v55, %v1221_v56  ;;  %v2625_v6 = vadd.f32 %v1725_v59, %v421_v36  ;;  %v656_v49 = vadd.s32 1, %v1431_v34 }
 0x1dc   : > { %v956_v18 = vsel %vm949_vm14, %v952_v54, %v955_v47  ;;  %vm1438_vm2 = vcmp.lt.s32.totalorder %v1437_v39, 0  ;;  %v806_v15 = vadd.s32 %v2527_v22, %v2519_v50  ;;  %v843_v52 = vadd.s32 3, %v839_v9 }
 0x1dd   : > { %v957_v12 = vsel %vm946_vm11, nan, %v956_v18  ;;  %v821_v62 = vsel %vm1438_vm2, 0, %v1437_v39  ;;  %v1227_v11 = vadd.s32 536870912, %v1226_v44  ;;  %vm657_vm3 = vcmp.gt.s32.totalorder %v656_v49, 0 }
 0x1de   : > { %1274 = vst [vmem:[%s2432_s6 + $0x20] sm:$0xff] %v957_v12  ;;  %v822_v38 = vsub.s32 32, %v821_v62  ;;  %v826_v8 = vsub.s32 4294967266, %v821_v62  ;;  %v654_v4 = vor.u32 8388608, %v653_v42  ;;  %v658_v51 = vsel %vm657_vm3, %v656_v49, 0 }
 0x1df   : > { %v2632_v16 = vshrl.u32 %v1227_v11, 30  ;;  %v1065_v57 = vand.u32 2139095040, %v2625_v6  ;;  %v823_v7 = vshll.u32 %v2579_v24, %v821_v62  ;;  %v660_v14 = vand.u32 31, %v658_v51 }
 0x1e0   : > { %v824_v20 = vshrl.u32 %v806_v15, %v822_v38  ;;  %v827_v59 = vadd.s32 127, %v826_v8  ;;  %v2637_v28 = vand.u32 3, %v843_v52  ;;  %v1222_v29 = vadd.s32 %v2589_v53, %v2595_v1 }
 0x1e1   : > { %v1229_v26 = vshll.u32 %v2632_v16, 30  ;;  %v661_v27 = vsub.s32 32, %v660_v14  ;;  %v2640_v0 = vshrl.u32 %v658_v51, 5  ;;  %v2642_v43 = vshll.u32 %v654_v4, 8 }
 0x1e2   : > { %v825_v50 = vor.u32 %v824_v20, %v823_v7  ;;  %v828_v22 = vshll.u32 %v827_v59, 23  ;;  %v1066_v45 = vshrl.u32 %v1065_v57, 23  ;;  %v669_v3 = vshll.u32 %v1879_v19, %v660_v14 }
 0x1e3   : > { %v1230_v31 = vsub.s32 %v1226_v44, %v1229_v26  ;;  %v664_v36 = vshrl.u32 %v1878_v17, %v661_v27  ;;  %v667_v37 = vshrl.u32 %v1879_v19, %v661_v27  ;;  %v670_v32 = vshrl.u32 %v1880_v21, %v661_v27 }
 0x1e4   : > { %v829_v35 = vor.u32 4788187, %v828_v22  ;;  %v832_v41 = vcvt.s32.f32 %v825_v50  ;;  %v673_v53 = vshrl.u32 %v1881_v23, %v661_v27  ;;  %v663_v48 = vshll.u32 %v1877_v13, %v660_v14 }
 0x1e5   : > { %v1232_v24 = vsub.s32 0, %v1230_v31  ;;  %v666_v58 = vshll.u32 %v1878_v17, %v660_v14  ;;  %v672_v33 = vshll.u32 %v1880_v21, %v660_v14  ;;  %v1252_v40 = vsub.s32 4, %v2632_v16 }
 0x1e6   : > { %v830_v5 = vand.u32 2147483647, %v829_v35  ;;  %v671_v47 = vor.u32 %v670_v32, %v669_v3  ;;  %v1447_v9 = vadd.s32 4294967169, %v1066_v45  ;;  %vm1168_vm4 = vcmp.lt.s32.totalorder %v2456_v61, 0 }
 0x1e7   : > { %v1452_v1 = vmin.u32 %v1232_v24, %v1230_v31  ;;  %v665_v54 = vor.u32 %v664_v36, %v663_v48  ;;  %v668_v39 = vor.u32 %v667_v37, %v666_v58  ;;  %v674_v55 = vor.u32 %v673_v53, %v672_v33 }
 0x1e8   : > { %v833_v2 = vmul.f32 %v832_v41, %v830_v5  ;;  %v662_v18 = vshrl.u32 %v1877_v13, %v661_v27  ;;  %v675_v44 = vshll.u32 %v1881_v23, %v660_v14  ;;  %v676_v42 = vshrl.u32 %v1882_v30, %v661_v27 }
 0x1e9   : > { %v1234_v56 = vclz %v1452_v1  ;;  %vm678_vm5 = vcmp.lt.s32.totalorder %v2640_v0, 1  ;;  %vm679_vm6 = vcmp.lt.s32.totalorder %v2640_v0, 2  ;;  %vm681_vm7 = vcmp.lt.s32.totalorder %v2640_v0, 4 }
 0x1ea   : > { %v834_v34 = vxor.u32 2147483648, %v833_v2  ;;  %v677_v15 = vor.u32 %v676_v42, %v675_v44  ;;  %vm680_vm8 = vcmp.lt.s32.totalorder %v2640_v0, 3  ;;  %v683_v62 = vsel %vm681_vm7, %v671_v47, 2102212464 }
 0x1eb   : > { %v1453_v12 = vadd.s32 4294967294, %v1234_v56  ;;  %v686_v38 = vsel %vm678_vm5, %v665_v54, %v668_v39  ;;  %v687_v8 = vsel %vm681_vm7, %v674_v55, 920167782  ;;  %v682_v4 = vsel %vm678_vm5, %v662_v18, %v665_v54 }
 0x1ec   : > { %v835_v49 = vsel %vm752_vm13, %v834_v34, %v833_v2  ;;  %v688_v51 = vsel %vm680_vm8, %v671_v47, %v687_v8  ;;  %v684_v25 = vsel %vm680_vm8, %v668_v39, %v683_v62  ;;  %v690_v14 = vsel %vm678_vm5, %v668_v39, %v671_v47 }
 0x1ed   : > { %v838_v11 = vsel %vm2599_vm12, %v2418_v63, %v835_v49  ;;  %vm1454_vm9 = vcmp.lt.s32.totalorder %v1453_v12, 0  ;;  %v689_v59 = vsel %vm679_vm6, %v686_v38, %v688_v51  ;;  %v691_v26 = vsel %vm681_vm7, %v677_v15, 1326507024 }
 0x1ee   : > { %1709 = vcosq.f32 %v838_v11  ;;  %v1237_v52 = vsel %vm1454_vm9, 0, %v1453_v12  ;;  %v692_v27 = vsel %vm680_vm8, %v674_v55, %v691_v26  ;;  %v1072_v35 = vadd.s32 1, %v1447_v9 }
 0x1ef   : > { %1711 = vsinq.f32 %v838_v11  ;;  %v1238_v57 = vsub.s32 32, %v1237_v52  ;;  %v1242_v7 = vsub.s32 4294967266, %v1237_v52  ;;  %v1239_v20 = vshll.u32 %v1230_v31, %v1237_v52 }
 0x1f0   : > { %v1253_v45 = vsel %vm1168_vm4, %v1252_v40, %v2632_v16  ;;  %v693_v31 = vsel %vm679_vm6, %v690_v14, %v692_v27  ;;  %v2692_v24 = vmul.u32.u64.low %v2642_v43, %v689_v59  ;;  %v2693_v36 = vmul.u32.u64.high %v2642_v43, %v689_v59, %v2692_v24 }
 0x1f1   : > { %v1240_v50 = vshrl.u32 %v1222_v29, %v1238_v57  ;;  %v1243_v22 = vadd.s32 127, %v1242_v7  ;;  %v2697_v29 = vmul.u32.u64.low %v2642_v43, %v693_v31  ;;  %v2698_v5 = vmul.u32.u64.high %v2642_v43, %v693_v31, %v2697_v29 }
 0x1f2   : > { %vm2702_vm10 = vcmp.le.f32.partialorder %v1166_v60, 0.7853982  ;;  %v685_v16 = vsel %vm679_vm6, %v682_v4, %v684_v25  ;;  %v1062_v32 = vand.u32 2147483647, %v2625_v6  ;;  %vm1073_vm11 = vcmp.gt.s32.totalorder %v1072_v35, 0 }
 0x1f3   : > { %v1241_v37 = vor.u32 %v1240_v50, %v1239_v20  ;;  %v1244_v3 = vshll.u32 %v1243_v22, 23  ;;  %vm842_vm12 = vweird.f32 %v2418_v63  ;;  %vm845_vm13 = vcmp.lt.s32.totalorder %v2637_v28, 2 }
 0x1f4   : > { %v1255_v1 = vsel %vm2702_vm10, 0, %v1253_v45  ;;  %v1074_v48 = vsel %vm1073_vm11, %v1072_v35, 0  ;;  %vm846_vm14 = vcmp.eq.s32.totalorder %v2637_v28, 0  ;;  %vm849_vm15 = vcmp.eq.s32.totalorder %v2637_v28, 2 }
 0x1f5   : > { %v1245_v53 = vor.u32 4788187, %v1244_v3  ;;  %v704_v60 = vadd.s32 1, %v2693_v36  ;;  %v1076_v0 = vand.u32 31, %v1074_v48  ;;  %v1248_v33 = vcvt.s32.f32 %v1241_v37 }
 0x1f6   : > { %v701_v2 = vmul.u32 %v2642_v43, %v685_v16  ;;  %vm703_vm0 = vc.u32 %v2698_v5, %v2692_v24  ;;  %v1259_v47 = vadd.s32 3, %v1255_v1  ;;  %v1069_v56 = vand.u32 8388607, %v1062_v32 }
 0x1f7   : > { %v1246_v58 = vand.u32 2147483647, %v1245_v53  ;;  %v705_v9 = vsel %vm703_vm0, %v704_v60, %v2693_v36  ;;  %v1077_v54 = vsub.s32 32, %v1076_v0  ;;  %v2722_v44 = vshrl.u32 %v1074_v48, 5 }
 0x1f8   : > { %v1710_v40 = vpop.eup %1709  ;;  %v706_v18 = vadd.s32 %v705_v9, %v701_v2  ;;  %v1079_v43 = vshll.u32 %v1877_v13, %v1076_v0  ;;  %v1082_v38 = vshll.u32 %v1878_v17, %v1076_v0  ;;  %v1085_v4 = vshll.u32 %v1879_v19, %v1076_v0 }
 0x1f9   : > { %v1712_v39 = vpop.eup %1711  ;;  %v850_v55 = vxor.u32 2147483648, %v1710_v40  ;;  %v1249_v34 = vmul.f32 %v1248_v33, %v1246_v58  ;;  %v1080_v12 = vshrl.u32 %v1878_v17, %v1077_v54  ;;  %v1083_v49 = vshrl.u32 %v1879_v19, %v1077_v54 }
 0x1fa   : > { %v847_v42 = vxor.u32 2147483648, %v1712_v39  ;;  %v707_v11 = vadd.s32 536870912, %v706_v18  ;;  %v1086_v51 = vshrl.u32 %v1880_v21, %v1077_v54  ;;  %v1088_v19 = vshll.u32 %v1880_v21, %v1076_v0 }
 0x1fb   : > { %v851_v15 = vsel %vm849_vm15, %v850_v55, %v1712_v39  ;;  %v1250_v62 = vxor.u32 2147483648, %v1249_v34  ;;  %v1081_v52 = vor.u32 %v1080_v12, %v1079_v43  ;;  %v1084_v20 = vor.u32 %v1083_v49, %v1082_v38 }
 0x1fc   : > { %v848_v8 = vsel %vm846_vm14, %v1710_v40, %v847_v42  ;;  %v2738_v25 = vshrl.u32 %v707_v11, 30  ;;  %v1089_v14 = vshrl.u32 %v1881_v23, %v1077_v54  ;;  %v1091_v26 = vshll.u32 %v1881_v23, %v1076_v0 }
 0x1fd   : > { %v852_v57 = vsel %vm845_vm13, %v848_v8, %v851_v15  ;;  %v1251_v7 = vsel %vm1168_vm4, %v1250_v62, %v1249_v34  ;;  %v1092_v50 = vshrl.u32 %v1882_v30, %v1077_v54  ;;  %v1070_v22 = vor.u32 8388608, %v1069_v56 }
 0x1fe   : > { %v853_v17 = vsel %vm842_vm12, nan, %v852_v57  ;;  %v1254_v59 = vsel %vm2702_vm10, %v2456_v61, %v1251_v7  ;;  %v709_v28 = vshll.u32 %v2738_v25, 30  ;;  %v1087_v63 = vor.u32 %v1086_v51, %v1085_v4 }
 0x1ff   : > { %1273 = vst [vmem:[%s2432_s6 + $0x18] sm:$0xff] %v853_v17  ;;  %1713 = vcosq.f32 %v1254_v59  ;;  %v1090_v27 = vor.u32 %v1089_v14, %v1088_v19  ;;  %v1093_v45 = vor.u32 %v1092_v50, %v1091_v26  ;;  %vm1094_vm1 = vcmp.lt.s32.totalorder %v2722_v44, 1 }
 0x200   : > { %1715 = vsinq.f32 %v1254_v59  ;;  %v710_v35 = vsub.s32 %v706_v18, %v709_v28  ;;  %vm1097_vm2 = vcmp.lt.s32.totalorder %v2722_v44, 4  ;;  %v1102_v21 = vsel %vm1094_vm1, %v1081_v52, %v1084_v20 }
 0x201   : > { %v1260_v31 = vand.u32 3, %v1259_v47  ;;  %vm1096_vm3 = vcmp.lt.s32.totalorder %v2722_v44, 3  ;;  %v1103_v23 = vsel %vm1097_vm2, %v1090_v27, 920167782  ;;  %vm1095_vm4 = vcmp.lt.s32.totalorder %v2722_v44, 2 }
 0x202   : > { %v712_v36 = vsub.s32 0, %v710_v35  ;;  %v1104_v30 = vsel %vm1096_vm3, %v1087_v63, %v1103_v23  ;;  %v1107_v37 = vsel %vm1097_vm2, %v1093_v45, 1326507024  ;;  %v1110_v3 = vshll.u32 %v1070_v22, 8 }
 0x203   : > { %v1099_v41 = vsel %vm1097_vm2, %v1087_v63, 2102212464  ;;  %v1105_v16 = vsel %vm1095_vm4, %v1102_v21, %v1104_v30  ;;  %v1106_v53 = vsel %vm1094_vm1, %v1084_v20, %v1087_v63  ;;  %v1078_v1 = vshrl.u32 %v1877_v13, %v1077_v54 }
 0x204   : > { %v1432_v29 = vmin.u32 %v712_v36, %v710_v35  ;;  %v1108_v48 = vsel %vm1096_vm3, %v1090_v27, %v1107_v37  ;;  %v2762_v60 = vmul.u32.u64.low %v1110_v3, %v1105_v16  ;;  %v2763_v0 = vmul.u32.u64.high %v1110_v3, %v1105_v16, %v2762_v60 }
 0x205   : > { %v1098_v33 = vsel %vm1094_vm1, %v1078_v1, %v1081_v52  ;;  %v1100_v2 = vsel %vm1096_vm3, %v1084_v20, %v1099_v41  ;;  %v1109_v40 = vsel %vm1095_vm4, %v1106_v53, %v1108_v48  ;;  %vm1258_vm5 = vweird.f32 %v2456_v61 }
 0x206   : > { %v714_v58 = vclz %v1432_v29  ;;  %v2770_v56 = vmul.u32.u64.low %v1110_v3, %v1109_v40  ;;  %v2771_v39 = vmul.u32.u64.high %v1110_v3, %v1109_v40, %v2770_v56  ;;  %vm1265_vm6 = vcmp.eq.s32.totalorder %v1260_v31, 2 }
 0x207   : > { %v1101_v34 = vsel %vm1095_vm4, %v1098_v33, %v1100_v2  ;;  %v1120_v18 = vadd.s32 1, %v2763_v0  ;;  %vm1261_vm8 = vcmp.lt.s32.totalorder %v1260_v31, 2  ;;  %vm1262_vm9 = vcmp.eq.s32.totalorder %v1260_v31, 0 }
 0x208   : > { %v1433_v9 = vadd.s32 4294967294, %v714_v58  ;;  %v702_v49 = vadd.s32 %v2692_v24, %v2698_v5  ;;  %v1117_v8 = vmul.u32 %v1110_v3, %v1101_v34  ;;  %vm1119_vm10 = vc.u32 %v2771_v39, %v2762_v60 }
 0x209   : > { %v1714_v47 = vpop.eup %1713  ;;  %v1121_v51 = vsel %vm1119_vm10, %v1120_v18, %v2763_v0  ;;  %v732_v26 = vsub.s32 4, %v2738_v25  ;;  %vm648_vm11 = vcmp.lt.s32.totalorder %v2577_v46, 0  ;;  %vm647_vm12 = vcmp.le.f32.partialorder %v646_v10, 0.7853982 }
 0x20a   : > { %v1716_v55 = vpop.eup %1715  ;;  %v1266_v13 = vxor.u32 2147483648, %v1714_v47  ;;  %vm1434_vm7 = vcmp.lt.s32.totalorder %v1433_v9, 0  ;;  %v1122_v57 = vadd.s32 %v1121_v51, %v1117_v8  ;;  %v1118_v37 = vadd.s32 %v2762_v60, %v2771_v39 }
 0x20b   : > { %v1263_v54 = vxor.u32 2147483648, %v1716_v55  ;;  %v717_v43 = vsel %vm1434_vm7, 0, %v1433_v9  ;;  %v733_v27 = vsel %vm648_vm11, %v732_v26, %v2738_v25  ;;  %vm738_vm1 = vweird.f32 %v2577_v46 }
 0x20c   : > { %v1267_v42 = vsel %vm1265_vm6, %v1266_v13, %v1716_v55  ;;  %v718_v15 = vsub.s32 32, %v717_v43  ;;  %v722_v62 = vsub.s32 4294967266, %v717_v43  ;;  %v719_v38 = vshll.u32 %v710_v35, %v717_v43 }
 0x20d   : > { %v1264_v12 = vsel %vm1262_vm9, %v1714_v47, %v1263_v54  ;;  %v1123_v24 = vadd.s32 536870912, %v1122_v57  ;;  %v735_v21 = vsel %vm647_vm12, 0, %v733_v27  ;;  %vm1064_vm2 = vcmp.lt.s32.totalorder %v2625_v6, 0 }
 0x20e   : > { %v1268_v11 = vsel %vm1261_vm8, %v1264_v12, %v1267_v42  ;;  %v720_v52 = vshrl.u32 %v702_v49, %v718_v15  ;;  %v723_v4 = vadd.s32 127, %v722_v62  ;;  %v739_v23 = vadd.s32 3, %v735_v21 }
 0x20f   : > { %v1269_v44 = vsel %vm1258_vm5, nan, %v1268_v11  ;;  %v1124_v17 = vshrl.u32 %v1123_v24, 30  ;;  %vm1063_vm3 = vcmp.le.f32.partialorder %v1062_v32, 0.7853982  ;;  %vm1154_vm7 = vweird.f32 %v2625_v6 }
 0x210   : > { %1277 = vst [vmem:[%s2432_s6 + $0x38] sm:$0xff] %v1269_v44  ;;  %v721_v7 = vor.u32 %v720_v52, %v719_v38  ;;  %v724_v20 = vshll.u32 %v723_v4, 23  ;;  %v740_v10 = vand.u32 3, %v739_v23 }
 0x211   : > { %v1125_v14 = vshll.u32 %v1124_v17, 30  ;;  %v1148_v13 = vsub.s32 4, %v1124_v17 }
 0x212   : > { %v725_v5 = vor.u32 4788187, %v724_v20  ;;  %v728_v19 = vcvt.s32.f32 %v721_v7  ;;  %vm745_vm14 = vcmp.eq.s32.totalorder %v740_v10, 2  ;;  %vm742_vm15 = vcmp.eq.s32.totalorder %v740_v10, 0 }
 0x213   : > { %v1126_v50 = vsub.s32 %v1122_v57, %v1125_v14  ;;  %vm741_vm0 = vcmp.lt.s32.totalorder %v740_v10, 2  ;;  %v1149_v18 = vsel %vm1064_vm2, %v1148_v13, %v1124_v17 }
 0x214   : > { %v726_v59 = vand.u32 2147483647, %v725_v5 }
 0x215   : > { %v1128_v22 = vsub.s32 0, %v1126_v50 }
 0x216   : > { %v729_v28 = vmul.f32 %v728_v19, %v726_v59 }
 0x217   : > { %v1448_v45 = vmin.u32 %v1128_v22, %v1126_v50 }
 0x218   : > { %v730_v61 = vxor.u32 2147483648, %v729_v28 }
 0x219   : > { %v1130_v31 = vclz %v1448_v45 }
 0x21a   : > { %v731_v63 = vsel %vm648_vm11, %v730_v61, %v729_v28 }
 0x21b   : > { %v734_v35 = vsel %vm647_vm12, %v2577_v46, %v731_v63  ;;  %v1449_v36 = vadd.s32 4294967294, %v1130_v31  ;;  %v1151_v46 = vsel %vm1063_vm3, 0, %v1149_v18 }
 0x21c   : > { %1717 = vcosq.f32 %v734_v35  ;;  %v1155_v43 = vadd.s32 3, %v1151_v46 }
 0x21d   : > { %1719 = vsinq.f32 %v734_v35  ;;  %vm1450_vm13 = vcmp.lt.s32.totalorder %v1449_v36, 0 }
 0x21e   : > { %v1133_v30 = vsel %vm1450_vm13, 0, %v1449_v36  ;;  %v1156_v12 = vand.u32 3, %v1155_v43 }
 0x21f   : > { %v1134_v3 = vsub.s32 32, %v1133_v30  ;;  %v1138_v29 = vsub.s32 4294967266, %v1133_v30  ;;  %v1135_v41 = vshll.u32 %v1126_v50, %v1133_v30 }
 0x220   : > { %vm1161_vm4 = vcmp.eq.s32.totalorder %v1156_v12, 2  ;;  %vm1158_vm5 = vcmp.eq.s32.totalorder %v1156_v12, 0  ;;  %vm1157_vm6 = vcmp.lt.s32.totalorder %v1156_v12, 2 }
 0x221   : > { %v1136_v16 = vshrl.u32 %v1118_v37, %v1134_v3  ;;  %v1139_v25 = vadd.s32 127, %v1138_v29 }
 0x223   : > { %v1137_v0 = vor.u32 %v1136_v16, %v1135_v41  ;;  %v1140_v58 = vshll.u32 %v1139_v25, 23 }
 0x225   : > { %v1141_v40 = vor.u32 4788187, %v1140_v58  ;;  %v1144_v56 = vcvt.s32.f32 %v1137_v0 }
 0x226   : > { %v1718_v53 = vpop.eup %1717 }
 0x227   : > { %v1720_v1 = vpop.eup %1719  ;;  %v746_v48 = vxor.u32 2147483648, %v1718_v53  ;;  %v1142_v9 = vand.u32 2147483647, %v1141_v40 }
 0x228   : > { %v743_v33 = vxor.u32 2147483648, %v1720_v1 }
 0x229   : > { %v747_v2 = vsel %vm745_vm14, %v746_v48, %v1720_v1  ;;  %v1145_v55 = vmul.f32 %v1144_v56, %v1142_v9 }
 0x22a   : > { %v744_v47 = vsel %vm742_vm15, %v1718_v53, %v743_v33 }
 0x22b   : > { %v748_v60 = vsel %vm741_vm0, %v744_v47, %v747_v2  ;;  %v1146_v54 = vxor.u32 2147483648, %v1145_v55 }
 0x22c   : > { %v749_v39 = vsel %vm738_vm1, nan, %v748_v60 }
 0x22d   : > { %1272 = vst [vmem:[%s2432_s6 + $0x10] sm:$0xff] %v749_v39  ;;  %v1147_v34 = vsel %vm1064_vm2, %v1146_v54, %v1145_v55 }
 0x22e   : > { %v1150_v42 = vsel %vm1063_vm3, %v2625_v6, %v1147_v34 }
 0x22f   : > { %1721 = vcosq.f32 %v1150_v42 }
 0x230   : > { %1723 = vsinq.f32 %v1150_v42 }
 0x239   : > { %v1722_v49 = vpop.eup %1721 }
 0x23a   : > { %v1724_v15 = vpop.eup %1723  ;;  %v1162_v62 = vxor.u32 2147483648, %v1722_v49 }
 0x23b   : > { %v1159_v11 = vxor.u32 2147483648, %v1724_v15 }
 0x23c   : > { %v1163_v32 = vsel %vm1161_vm4, %v1162_v62, %v1724_v15 }
 0x23d   : > { %v1160_v38 = vsel %vm1158_vm5, %v1722_v49, %v1159_v11 }
 0x23e   : > { %v1164_v8 = vsel %vm1157_vm6, %v1160_v38, %v1163_v32 }
 0x23f   : > { %v1165_v44 = vsel %vm1154_vm7, nan, %v1164_v8 }
 0x240   : > { %1276 = vst [vmem:[%s2432_s6 + $0x30] sm:$0xff] %v1165_v44 }
 0x241   : > { %1798 = shalt.err (!%p1795_p9)
}
 0x242   : > { %s1799_s27 = scalar_lea.hbm %s2804_s7, 1024  ;;  %s1803_s22 = scalar_lea.hbm %s2861_s4, 2048 }
 0x243   : > { %p1800_p1 = scmp.ne.s32.totalorder %s2804_s7, %s1799_s27  ;;  %p1804_p7 = scmp.lt.u32.totalorder %s2804_s7, %s2861_s4 }
 0x244   : > { %p1805_p13 = scmp.lt.u32.totalorder %s1803_s22, %s1799_s27  ;;  %p1807_p6 = scmp.lt.u32.totalorder %s1799_s27, %s2804_s7 }
 0x245   : > { %p1801_p2 = pnand %p1800_p1, %p2010_p10 }
 0x246   : > { %p1806_p4 = por %p1805_p13, %p1804_p7 }
 0x247   : > { %p1802_p3 = pneg %p1801_p2 }
 0x248   : > { %p1808_p8 = por %p1807_p6, %p1806_p4 }
 0x24a   : > { %p1809_p12 = pnand %p1808_p8, %p1802_p3 }
 0x24c   : > { %1812 = shalt.err (!%p1809_p12)
}
 0x24d   : > { %s1884_s29 = smov 128   ;;  %s1885_s11 = smov 8  }
 0x24e   : > { %1616 = dma.vmem_to_hbm [thread:$0]  (%p2010_p10), %s2806_s9, 1024, %s2804_s7, %s1279_s18, %s1884_s29, %s1884_s29, %s1885_s11  }
 0x24f PF: > { %s1309_s13 = sand.u32 1, %s1851_s15   ;;  %p2891_p11 = scmp.ne.s32.totalorder %s2869_s26, 0 }
 0x250   : > { %p2892_p0 = scmp.ge.s32.totalorder %s1871_s20, 2  ;;  %s1310_s24 = scalar_lea.sflag [#allocation4], %s1309_s13 }
 0x252   : > { %p1627_p5 = pnand %p2892_p0, %p2891_p11 }
 0x254   : > { %1846 = dma.done.wait (!%p1627_p5), %s1310_s24, 1024  }
 0x255   : > { %1848 = vsyncadd (!%p1627_p5), %s1310_s24, 4294966272  ;;  %s21_s20 = sadd.s32 1, %s1871_s20   ;;  %s2893_s15 = smov %s1855_s16 }
 0x256   : > { %p18_p9 = scmp.ge.s32.totalorder %s21_s20, 4   ;;  %s2894_s16 = smov %s1859_s17 }
 0x257   : > { %s2895_s17 = smov %s2019_s10  ;;  %s2896_s18 = smov %s1867_s19 }
 0x258   : > { %s2897_s19 = smov %s2899_s5  ;;  %20 = sbr.rel (!%p18_p9) target bundleno = 7 (0x7), region = 91 }
 0x25f   :  { %1315 = vsyncpa [#allocation3], 1 }
 0x260   :  { %1317 = vsyncpa [#allocation3 + $0x1], 1 }
 0x261   :  { %1318 = vsyncpa [#allocation6], 1 }
 0x262   :  { %1319 = vsyncpa [#allocation4], 1 }
 0x263   :  { %1321 = vsyncpa [#allocation4 + $0x1], 1 }

</bundles_post_ra>
